<compile_context>
chip_gen: v7x
topology: tpu7x:2x2x1
jax: 0.10.0
libtpu: 0.0.40
codegen_flags: <defaults>
</compile_context>

<pallas_src>
import jax
import jax.numpy as jnp
from jax.experimental import pallas as pl
from jax.experimental.pallas import tpu as pltpu

INPUT_SIZE = OUTPUT_SIZE = 28 * 28   # 784
HIDDEN_SIZE = 128
LATENT_SIZE = 16

# Lane-dense padded feature dim: 896 = 7 * 128.
PAD_IN = PAD_OUT = 896
# 128 matches the MXU M dimension on all generations (v5e 128x128; v6e/v7x
# 256x256 would also accept 256 but 128 keeps the tail padding small).
TILE_B = 128


def _vae_kernel(
    x_ref, eps_ref,
    w_enc_ref, b_enc_ref,
    w_heads_ref, b_heads_ref,
    w_d1_ref, b_d1_ref,
    w_d2_ref, b_d2_ref,
    rex_ref, musig_ref,
):
    # ----- Encoder: h = relu(x @ W_enc + b_enc) -----
    h = jnp.dot(x_ref[...], w_enc_ref[...], preferred_element_type=jnp.float32)
    h = jnp.maximum(h + b_enc_ref[...], 0.0)

    # ----- Fused mu|sigma head: one [128, 32] matmul -----
    musig = jnp.dot(h.astype(jnp.bfloat16), w_heads_ref[...],
                    preferred_element_type=jnp.float32) + b_heads_ref[...]
    mu = musig[:, :LATENT_SIZE]
    sigma = musig[:, LATENT_SIZE:]

    # ----- Reparameterization: z = mu + eps * sigma -----
    z = mu + eps_ref[...] * sigma

    # ----- Decoder: relu(z @ W_d1 + b_d1) -> sigmoid(h_d @ W_d2 + b_d2) -----
    hd = jnp.dot(z.astype(jnp.bfloat16), w_d1_ref[...],
                 preferred_element_type=jnp.float32)
    hd = jnp.maximum(hd + b_d1_ref[...], 0.0)
    logits = jnp.dot(hd.astype(jnp.bfloat16), w_d2_ref[...],
                     preferred_element_type=jnp.float32) + b_d2_ref[...]

    rex_ref[...] = jax.nn.sigmoid(logits).astype(rex_ref.dtype)
    musig_ref[...] = musig.astype(musig_ref.dtype)


@jax.jit
def vae_forward(x, eps, kparams):
    """x: (B, 784) f32, eps: (B, 16) f32, kparams from prepare_params()."""
    B = x.shape[0]
    n_tiles = pl.cdiv(B, TILE_B)
    B_pad = n_tiles * TILE_B

    # Zero-pad batch to a multiple of TILE_B and features to 896; cast x to
    # bf16 (halves the dominant activation DMA). Zero padding is exact:
    # padded input columns hit zero weight rows, padded rows are sliced off.
    xp = jnp.pad(x, ((0, B_pad - B), (0, PAD_IN - INPUT_SIZE))).astype(jnp.bfloat16)
    epsp = jnp.pad(eps, ((0, B_pad - B), (0, 0)))

    const_spec = lambda shape: pl.BlockSpec(shape, lambda i: (0, 0))
    in_specs = [
        pl.BlockSpec((TILE_B, PAD_IN), lambda i: (i, 0)),          # x tile
        pl.BlockSpec((TILE_B, LATENT_SIZE), lambda i: (i, 0)),     # eps tile
        const_spec((PAD_IN, HIDDEN_SIZE)),                         # w_enc
        const_spec((1, HIDDEN_SIZE)),                              # b_enc
        const_spec((HIDDEN_SIZE, 2 * LATENT_SIZE)),                # w_heads
        const_spec((1, 2 * LATENT_SIZE)),                          # b_heads
        const_spec((LATENT_SIZE, HIDDEN_SIZE)),                    # w_d1
        const_spec((1, HIDDEN_SIZE)),                              # b_d1
        const_spec((HIDDEN_SIZE, PAD_OUT)),                        # w_d2
        const_spec((1, PAD_OUT)),                                  # b_d2
    ]
    out_specs = (
        pl.BlockSpec((TILE_B, PAD_OUT), lambda i: (i, 0)),         # re_x (padded)
        pl.BlockSpec((TILE_B, 2 * LATENT_SIZE), lambda i: (i, 0)), # mu|sigma
    )
    out_shapes = (
        jax.ShapeDtypeStruct((B_pad, PAD_OUT), jnp.float32),
        jax.ShapeDtypeStruct((B_pad, 2 * LATENT_SIZE), jnp.float32),
    )

    flops = 2 * B_pad * (PAD_IN * HIDDEN_SIZE
                         + HIDDEN_SIZE * 2 * LATENT_SIZE
                         + LATENT_SIZE * HIDDEN_SIZE
                         + HIDDEN_SIZE * PAD_OUT)
    weight_bytes = 2 * (PAD_IN * HIDDEN_SIZE + HIDDEN_SIZE * 2 * LATENT_SIZE
                        + LATENT_SIZE * HIDDEN_SIZE + HIDDEN_SIZE * PAD_OUT)
    bias_bytes = 4 * (HIDDEN_SIZE + 2 * LATENT_SIZE + HIDDEN_SIZE + PAD_OUT)
    bytes_accessed = (xp.size * 2 + epsp.size * 4 + weight_bytes + bias_bytes
                      + B_pad * PAD_OUT * 4 + B_pad * 2 * LATENT_SIZE * 4)
    cost = pl.CostEstimate(flops=flops,
                           transcendentals=B_pad * PAD_OUT,   # sigmoid exp
                           bytes_accessed=bytes_accessed)

    rex_p, musig_p = pl.pallas_call(
        _vae_kernel,
        out_shape=out_shapes,
        grid=(n_tiles,),
        in_specs=in_specs,
        out_specs=out_specs,
        compiler_params=pltpu.CompilerParams(
            dimension_semantics=("parallel",),
            vmem_limit_bytes=16 << 20,
        ),
        cost_estimate=cost,
    )(
        xp, epsp,
        kparams["w_enc"], kparams["b_enc"],
        kparams["w_heads"], kparams["b_heads"],
        kparams["w_d1"], kparams["b_d1"],
        kparams["w_d2"], kparams["b_d2"],
    )

    re_x = rex_p[:B, :OUTPUT_SIZE]
    mu = musig_p[:B, :LATENT_SIZE]
    sigma = musig_p[:B, LATENT_SIZE:]
    return re_x, mu, sigma


def _init_linear(key, n_in, n_out):
    # PyTorch nn.Linear default init: U(-1/sqrt(n_in), 1/sqrt(n_in)).
    kw, kb = jax.random.split(key)
    bound = 1.0 / (n_in ** 0.5)
    # Stored transposed: [in, out] so the kernel computes x @ W + b.
    w = jax.random.uniform(kw, (n_in, n_out), jnp.float32, -bound, bound)
    b = jax.random.uniform(kb, (1, n_out), jnp.float32, -bound, bound)
    return w, b


def init_params(key):
    keys = jax.random.split(key, 5)
    w_enc, b_enc = _init_linear(keys[0], INPUT_SIZE, HIDDEN_SIZE)
    w_mu, b_mu = _init_linear(keys[1], HIDDEN_SIZE, LATENT_SIZE)
    w_sg, b_sg = _init_linear(keys[2], HIDDEN_SIZE, LATENT_SIZE)
    w_d1, b_d1 = _init_linear(keys[3], LATENT_SIZE, HIDDEN_SIZE)
    w_d2, b_d2 = _init_linear(keys[4], HIDDEN_SIZE, OUTPUT_SIZE)
    return dict(w_enc=w_enc, b_enc=b_enc, w_mu=w_mu, b_mu=b_mu,
                w_sg=w_sg, b_sg=b_sg, w_d1=w_d1, b_d1=b_d1,
                w_d2=w_d2, b_d2=b_d2)


def prepare_params(p):
    """Pack/pad raw [in,out] params into kernel layout (bf16 weights, f32 biases)."""
    w_enc = jnp.pad(p["w_enc"], ((0, PAD_IN - INPUT_SIZE), (0, 0))).astype(jnp.bfloat16)
    w_heads = jnp.concatenate([p["w_mu"], p["w_sg"]], axis=1).astype(jnp.bfloat16)
    b_heads = jnp.concatenate([p["b_mu"], p["b_sg"]], axis=1)
    w_d2 = jnp.pad(p["w_d2"], ((0, 0), (0, PAD_OUT - OUTPUT_SIZE))).astype(jnp.bfloat16)
    b_d2 = jnp.pad(p["b_d2"], ((0, 0), (0, PAD_OUT - OUTPUT_SIZE)))
    return dict(
        w_enc=w_enc, b_enc=p["b_enc"],
        w_heads=w_heads, b_heads=b_heads,
        w_d1=p["w_d1"].astype(jnp.bfloat16), b_d1=p["b_d1"],
        w_d2=w_d2, b_d2=b_d2,
    )


def _reference_forward(x, eps, p):
    # Pure-JAX reference with the same bf16 matmul inputs / f32 accumulation.
    f32 = jnp.float32
    h = jnp.dot(x.astype(jnp.bfloat16), p["w_enc"].astype(jnp.bfloat16),
                preferred_element_type=f32) + p["b_enc"]
    h = jnp.maximum(h, 0.0)
    mu = jnp.dot(h.astype(jnp.bfloat16), p["w_mu"].astype(jnp.bfloat16),
                 preferred_element_type=f32) + p["b_mu"]
    sigma = jnp.dot(h.astype(jnp.bfloat16), p["w_sg"].astype(jnp.bfloat16),
                    preferred_element_type=f32) + p["b_sg"]
    z = mu + eps * sigma
    hd = jnp.dot(z.astype(jnp.bfloat16), p["w_d1"].astype(jnp.bfloat16),
                 preferred_element_type=f32) + p["b_d1"]
    hd = jnp.maximum(hd, 0.0)
    logits = jnp.dot(hd.astype(jnp.bfloat16), p["w_d2"].astype(jnp.bfloat16),
                     preferred_element_type=f32) + p["b_d2"]
    return jax.nn.sigmoid(logits), mu, sigma


if __name__ == "__main__":
    key = jax.random.PRNGKey(0)
    k_params, k_x, k_eps = jax.random.split(key, 3)

    B = 8
    params = init_params(k_params)
    kparams = prepare_params(params)
    x = jax.random.uniform(k_x, (B, INPUT_SIZE), jnp.float32)   # pixel-like inputs
    # eps ~ N(0, 1), matches torch.randn_like(sigma); generated host-side so
    # the kernel stays deterministic w.r.t. its inputs.
    eps = jax.random.normal(k_eps, (B, LATENT_SIZE), jnp.float32)

    re_x, mu, sigma = vae_forward(x, eps, kparams)
    jax.block_until_ready((re_x, mu, sigma))

    assert re_x.shape == (B, OUTPUT_SIZE)
    assert mu.shape == (B, LATENT_SIZE) and sigma.shape == (B, LATENT_SIZE)

    # Sanity check against a pure-JAX reference using the same bf16 casts.
    ref_rex, ref_mu, ref_sigma = _reference_forward(x, eps, params)
    assert jnp.allclose(re_x, ref_rex, atol=1e-3, rtol=1e-3)
    assert jnp.allclose(mu, ref_mu, atol=1e-3, rtol=1e-3)
    assert jnp.allclose(sigma, ref_sigma, atol=1e-3, rtol=1e-3)

    print("KERNEL_OK")
</pallas_src>

<mosaic_0001>
module attributes {stable_mosaic.version = 11 : i64} {
  func.func @_vae_kernel(%arg0: i32, %arg1: memref<128x896xbf16, #tpu.memory_space<vmem>>, %arg2: memref<128x16xf32, #tpu.memory_space<vmem>>, %arg3: memref<896x128xbf16, #tpu.memory_space<vmem>>, %arg4: memref<1x128xf32, #tpu.memory_space<vmem>>, %arg5: memref<128x32xbf16, #tpu.memory_space<vmem>>, %arg6: memref<1x32xf32, #tpu.memory_space<vmem>>, %arg7: memref<16x128xbf16, #tpu.memory_space<vmem>>, %arg8: memref<1x128xf32, #tpu.memory_space<vmem>>, %arg9: memref<128x896xbf16, #tpu.memory_space<vmem>>, %arg10: memref<1x896xf32, #tpu.memory_space<vmem>>, %arg11: memref<128x896xf32, #tpu.memory_space<vmem>>, %arg12: memref<128x32xf32, #tpu.memory_space<vmem>>) attributes {dimension_semantics = [#tpu.dimension_semantics<parallel>], iteration_bounds = array<i64: 1>, scalar_prefetch = 0 : i64, scratch_operands = 0 : i64, tpu.core_type = #tpu.core_type<tc>, window_params = [{transform_indices = @transform_0, window_bounds = array<i64: 128, 896>}, {transform_indices = @transform_1, window_bounds = array<i64: 128, 16>}, {pipeline_mode = #tpu.pipeline_mode<synchronous>, transform_indices = @transform_2, window_bounds = array<i64: 896, 128>}, {pipeline_mode = #tpu.pipeline_mode<synchronous>, transform_indices = @transform_3, window_bounds = array<i64: 1, 128>}, {pipeline_mode = #tpu.pipeline_mode<synchronous>, transform_indices = @transform_4, window_bounds = array<i64: 128, 32>}, {pipeline_mode = #tpu.pipeline_mode<synchronous>, transform_indices = @transform_5, window_bounds = array<i64: 1, 32>}, {pipeline_mode = #tpu.pipeline_mode<synchronous>, transform_indices = @transform_6, window_bounds = array<i64: 16, 128>}, {pipeline_mode = #tpu.pipeline_mode<synchronous>, transform_indices = @transform_7, window_bounds = array<i64: 1, 128>}, {pipeline_mode = #tpu.pipeline_mode<synchronous>, transform_indices = @transform_8, window_bounds = array<i64: 128, 896>}, {pipeline_mode = #tpu.pipeline_mode<synchronous>, transform_indices = @transform_9, window_bounds = array<i64: 1, 896>}, {transform_indices = @transform_10, window_bounds = array<i64: 128, 896>}, {transform_indices = @transform_11, window_bounds = array<i64: 128, 32>}]} {
    %c0 = arith.constant 0 : index
    %c0_0 = arith.constant 0 : index
    %0 = vector.load %arg1[%c0, %c0_0] : memref<128x896xbf16, #tpu.memory_space<vmem>>, vector<128x896xbf16>
    %c0_1 = arith.constant 0 : index
    %c0_2 = arith.constant 0 : index
    %1 = vector.load %arg3[%c0_1, %c0_2] : memref<896x128xbf16, #tpu.memory_space<vmem>>, vector<896x128xbf16>
    %cst = arith.constant dense<0.000000e+00> : vector<128x128xf32>
    %2 = tpu.matmul %0, %1, %cst {dimension_numbers = #tpu.dot_dimension_numbers<[1], [0], [0], [1], [0, 0, 1, 1], [], []>} : vector<128x896xbf16>, vector<896x128xbf16>, vector<128x128xf32> -> vector<128x128xf32>
    %c0_3 = arith.constant 0 : index
    %c0_4 = arith.constant 0 : index
    %3 = vector.load %arg4[%c0_3, %c0_4] : memref<1x128xf32, #tpu.memory_space<vmem>>, vector<1x128xf32>
    %4 = vector.broadcast %3 : vector<1x128xf32> to vector<128x128xf32>
    %5 = arith.addf %2, %4 : vector<128x128xf32>
    %cst_5 = arith.constant 0.000000e+00 : f32
    %6 = vector.broadcast %cst_5 : f32 to vector<128x128xf32>
    %7 = arith.maximumf %5, %6 : vector<128x128xf32>
    %8 = arith.truncf %7 : vector<128x128xf32> to vector<128x128xbf16>
    %c0_6 = arith.constant 0 : index
    %c0_7 = arith.constant 0 : index
    %9 = vector.load %arg5[%c0_6, %c0_7] : memref<128x32xbf16, #tpu.memory_space<vmem>>, vector<128x32xbf16>
    %cst_8 = arith.constant dense<0.000000e+00> : vector<128x32xf32>
    %10 = tpu.matmul %8, %9, %cst_8 {dimension_numbers = #tpu.dot_dimension_numbers<[1], [0], [0], [1], [0, 0, 1, 1], [], []>} : vector<128x128xbf16>, vector<128x32xbf16>, vector<128x32xf32> -> vector<128x32xf32>
    %c0_9 = arith.constant 0 : index
    %c0_10 = arith.constant 0 : index
    %11 = vector.load %arg6[%c0_9, %c0_10] : memref<1x32xf32, #tpu.memory_space<vmem>>, vector<1x32xf32>
    %12 = vector.broadcast %11 : vector<1x32xf32> to vector<128x32xf32>
    %13 = arith.addf %10, %12 : vector<128x32xf32>
    %14 = vector.extract_strided_slice %13 {offsets = [0, 0], sizes = [128, 16], strides = [1, 1]} : vector<128x32xf32> to vector<128x16xf32>
    %15 = vector.extract_strided_slice %13 {offsets = [0, 16], sizes = [128, 16], strides = [1, 1]} : vector<128x32xf32> to vector<128x16xf32>
    %c0_11 = arith.constant 0 : index
    %c0_12 = arith.constant 0 : index
    %16 = vector.load %arg2[%c0_11, %c0_12] : memref<128x16xf32, #tpu.memory_space<vmem>>, vector<128x16xf32>
    %17 = arith.mulf %16, %15 : vector<128x16xf32>
    %18 = arith.addf %14, %17 : vector<128x16xf32>
    %19 = arith.truncf %18 : vector<128x16xf32> to vector<128x16xbf16>
    %c0_13 = arith.constant 0 : index
    %c0_14 = arith.constant 0 : index
    %20 = vector.load %arg7[%c0_13, %c0_14] : memref<16x128xbf16, #tpu.memory_space<vmem>>, vector<16x128xbf16>
    %cst_15 = arith.constant dense<0.000000e+00> : vector<128x128xf32>
    %21 = tpu.matmul %19, %20, %cst_15 {dimension_numbers = #tpu.dot_dimension_numbers<[1], [0], [0], [1], [0, 0, 1, 1], [], []>} : vector<128x16xbf16>, vector<16x128xbf16>, vector<128x128xf32> -> vector<128x128xf32>
    %c0_16 = arith.constant 0 : index
    %c0_17 = arith.constant 0 : index
    %22 = vector.load %arg8[%c0_16, %c0_17] : memref<1x128xf32, #tpu.memory_space<vmem>>, vector<1x128xf32>
    %23 = vector.broadcast %22 : vector<1x128xf32> to vector<128x128xf32>
    %24 = arith.addf %21, %23 : vector<128x128xf32>
    %cst_18 = arith.constant 0.000000e+00 : f32
    %25 = vector.broadcast %cst_18 : f32 to vector<128x128xf32>
    %26 = arith.maximumf %24, %25 : vector<128x128xf32>
    %27 = arith.truncf %26 : vector<128x128xf32> to vector<128x128xbf16>
    %c0_19 = arith.constant 0 : index
    %c0_20 = arith.constant 0 : index
    %28 = vector.load %arg9[%c0_19, %c0_20] : memref<128x896xbf16, #tpu.memory_space<vmem>>, vector<128x896xbf16>
    %cst_21 = arith.constant dense<0.000000e+00> : vector<128x896xf32>
    %29 = tpu.matmul %27, %28, %cst_21 {dimension_numbers = #tpu.dot_dimension_numbers<[1], [0], [0], [1], [0, 0, 1, 1], [], []>} : vector<128x128xbf16>, vector<128x896xbf16>, vector<128x896xf32> -> vector<128x896xf32>
    %c0_22 = arith.constant 0 : index
    %c0_23 = arith.constant 0 : index
    %30 = vector.load %arg10[%c0_22, %c0_23] : memref<1x896xf32, #tpu.memory_space<vmem>>, vector<1x896xf32>
    %31 = vector.broadcast %30 : vector<1x896xf32> to vector<128x896xf32>
    %32 = arith.addf %29, %31 : vector<128x896xf32>
    %33 = arith.negf %32 : vector<128x896xf32>
    %34 = math.exp %33 : vector<128x896xf32>
    %cst_24 = arith.constant 1.000000e+00 : f32
    %35 = vector.broadcast %cst_24 : f32 to vector<128x896xf32>
    %36 = arith.addf %35, %34 : vector<128x896xf32>
    %37 = arith.divf %35, %36 : vector<128x896xf32>
    %c0_25 = arith.constant 0 : index
    %c0_26 = arith.constant 0 : index
    %38 = vector.load %arg11[%c0_25, %c0_26] : memref<128x896xf32, #tpu.memory_space<vmem>>, vector<128x896xf32>
    tpu.vector_store %arg11[%c0_25, %c0_26], %37 {strides = array<i32>} : memref<128x896xf32, #tpu.memory_space<vmem>>, vector<128x896xf32>,
    %c0_27 = arith.constant 0 : index
    %c0_28 = arith.constant 0 : index
    %39 = vector.load %arg12[%c0_27, %c0_28] : memref<128x32xf32, #tpu.memory_space<vmem>>, vector<128x32xf32>
    tpu.vector_store %arg12[%c0_27, %c0_28], %13 {strides = array<i32>} : memref<128x32xf32, #tpu.memory_space<vmem>>, vector<128x32xf32>,
    return
  }
  func.func @transform_0(%arg0: i32) -> (i32, i32) {
    %c0_i32 = arith.constant 0 : i32
    %c0_i32_0 = arith.constant 0 : i32
    return %arg0, %c0_i32 : i32, i32
  }
  func.func @transform_1(%arg0: i32) -> (i32, i32) {
    %c0_i32 = arith.constant 0 : i32
    %c0_i32_0 = arith.constant 0 : i32
    return %arg0, %c0_i32 : i32, i32
  }
  func.func @transform_2(%arg0: i32) -> (i32, i32) {
    %c0_i32 = arith.constant 0 : i32
    %c0_i32_0 = arith.constant 0 : i32
    %c0_i32_1 = arith.constant 0 : i32
    return %c0_i32, %c0_i32_0 : i32, i32
  }
  func.func @transform_3(%arg0: i32) -> (i32, i32) {
    %c0_i32 = arith.constant 0 : i32
    %c0_i32_0 = arith.constant 0 : i32
    %c0_i32_1 = arith.constant 0 : i32
    return %c0_i32, %c0_i32_0 : i32, i32
  }
  func.func @transform_4(%arg0: i32) -> (i32, i32) {
    %c0_i32 = arith.constant 0 : i32
    %c0_i32_0 = arith.constant 0 : i32
    %c0_i32_1 = arith.constant 0 : i32
    return %c0_i32, %c0_i32_0 : i32, i32
  }
  func.func @transform_5(%arg0: i32) -> (i32, i32) {
    %c0_i32 = arith.constant 0 : i32
    %c0_i32_0 = arith.constant 0 : i32
    %c0_i32_1 = arith.constant 0 : i32
    return %c0_i32, %c0_i32_0 : i32, i32
  }
  func.func @transform_6(%arg0: i32) -> (i32, i32) {
    %c0_i32 = arith.constant 0 : i32
    %c0_i32_0 = arith.constant 0 : i32
    %c0_i32_1 = arith.constant 0 : i32
    return %c0_i32, %c0_i32_0 : i32, i32
  }
  func.func @transform_7(%arg0: i32) -> (i32, i32) {
    %c0_i32 = arith.constant 0 : i32
    %c0_i32_0 = arith.constant 0 : i32
    %c0_i32_1 = arith.constant 0 : i32
    return %c0_i32, %c0_i32_0 : i32, i32
  }
  func.func @transform_8(%arg0: i32) -> (i32, i32) {
    %c0_i32 = arith.constant 0 : i32
    %c0_i32_0 = arith.constant 0 : i32
    %c0_i32_1 = arith.constant 0 : i32
    return %c0_i32, %c0_i32_0 : i32, i32
  }
  func.func @transform_9(%arg0: i32) -> (i32, i32) {
    %c0_i32 = arith.constant 0 : i32
    %c0_i32_0 = arith.constant 0 : i32
    %c0_i32_1 = arith.constant 0 : i32
    return %c0_i32, %c0_i32_0 : i32, i32
  }
  func.func @transform_10(%arg0: i32) -> (i32, i32) {
    %c0_i32 = arith.constant 0 : i32
    %c0_i32_0 = arith.constant 0 : i32
    return %arg0, %c0_i32 : i32, i32
  }
  func.func @transform_11(%arg0: i32) -> (i32, i32) {
    %c0_i32 = arith.constant 0 : i32
    %c0_i32_0 = arith.constant 0 : i32
    return %arg0, %c0_i32 : i32, i32
  }
}

</mosaic_0001>

<bundles_post_ra>
// kernel: vae_forward.1
= control target key start
LH: loop header
LB: loop body
LE: loop exit
PB: predicated region body
PF: predicated region fallthrough
CT: control target
= control target key end

     0   :  { %17 = vsyncpa [#allocation3], 0  ;;  %s4721_s17 = smov [#allocation2]   ;;  %s6267_s0 = inlined_call_operand.vmem [shape: bf16[128,896], index: 0, kind: input, shape index: {}]   ;;  %s6268_s1 = inlined_call_operand.vmem [shape: f32[128,16], index: 1, kind: input, shape index: {}]   ;;  %s6269_s2 = inlined_call_operand.vmem [shape: bf16[896,128], index: 2, kind: input, shape index: {}]   ;;  %s6270_s3 = inlined_call_operand.vmem [shape: f32[1,128], index: 3, kind: input, shape index: {}]   ;;  %s6271_s4 = inlined_call_operand.vmem [shape: bf16[128,32], index: 4, kind: input, shape index: {}]   ;;  %s6272_s5 = inlined_call_operand.vmem [shape: f32[1,32], index: 5, kind: input, shape index: {}]   ;;  %s6273_s6 = inlined_call_operand.vmem [shape: bf16[16,128], index: 6, kind: input, shape index: {}]   ;;  %s6274_s7 = inlined_call_operand.vmem [shape: f32[1,128], index: 7, kind: input, shape index: {}]   ;;  %s6275_s8 = inlined_call_operand.hbm [shape: bf16[128,896], index: 8, kind: input, shape index: {}]   ;;  %s6276_s9 = inlined_call_operand.vmem [shape: f32[1,896], index: 9, kind: input, shape index: {}]   ;;  %s6277_s10 = inlined_call_operand.vmem [shape: f32[128,896], index: 10, kind: output, shape index: {0}]   ;;  %s6278_s11 = inlined_call_operand.vmem [shape: f32[128,32], index: 11, kind: output, shape index: {1}]  }
   0x1   :  { %s39_s18 = sshll.u32 %s4721_s17, 4  ;;  %s4697_s21 = scalar_lea.hbm %s6275_s8, 7168  ;;  %s40_s18 = int_to_ptr.vmem [resolvable:$true] %s39_s18 }
   0x2   :  { %p4698_p0 = scmp.ne.s32.totalorder %s6275_s8, %s4697_s21  ;;  %p4701_p1 = scmp.lt.u32.totalorder %s4697_s21, %s6275_s8 }
   0x4   :  { %p4703_p2 = pnand %p4701_p1, %p4698_p0 }
   0x6   :  { %4706 = shalt.err (!%p4703_p2)
}
   0x7   :  { %s4707_s26 = scalar_lea.vmem %s40_s18, 7168  ;;  %p4712_p4 = scmp.lt.s32.totalorder %s40_s18, %s40_s18 }
   0x8   :  { %p4708_p3 = scmp.ne.s32.totalorder %s40_s18, %s4707_s26  ;;  %p4713_p5 = scmp.lt.s32.totalorder %s4707_s26, %s4707_s26 }
   0xa   :  { %p4714_p6 = por %p4713_p5, %p4712_p4 }
   0xc   :  { %p4715_p7 = pnand %p4714_p6, %p4708_p3 }
   0xe   :  { %4718 = shalt.err (!%p4715_p7)
}
   0xf   :  { %s4722_s27 = smov 448   ;;  %s4723_s28 = smov 28  }
  0x10   :  { %45 = dma.hbm_to_vmem [thread:$0]  %s6275_s8, 7168, %s40_s18, [#allocation3], %s4722_s27, %s4722_s27, %s4723_s28  }
  0x11   :  { %4719 = dma.done.wait [#allocation3], 7168  }
  0x12   :  { %4720 = vsyncadd [#allocation3], 4294960128  ;;  %v4023_v0 = vld [vmem:[%s6269_s2 + $0x40] sm:$0xff]   ;;  %v4027_v4 = vld [vmem:[%s6269_s2 + $0x48] sm:$0xff]   ;;  %vm3329_vm0 = vcmask 261120   ;;  %vm1574_vm1 = vcmask 130048  }
  0x13   :  { %v4024_v1 = vld [vmem:[%s6269_s2] sm:$0xff]   ;;  %3655 = vmatprep.subr.bf16.mxu0 %v4023_v0  ;;  %v4028_v5 = vld [vmem:[%s6269_s2 + $0x8] sm:$0xff]   ;;  %v4031_v8 = vld [vmem:[%s6269_s2 + $0x50] sm:$0xff]  }
  0x14   :  { %v4025_v2 = vld [vmem:[%s6269_s2 + $0xc0] sm:$0xff]   ;;  %3656 = vmatpush3.bf16.msra.mxu0 %v4024_v1  ;;  %v4029_v6 = vld [vmem:[%s6269_s2 + $0xc8] sm:$0xff]   ;;  %v4032_v9 = vld [vmem:[%s6269_s2 + $0x10] sm:$0xff]  }
  0x15   :  { %v4026_v3 = vld [vmem:[%s6269_s2 + $0x80] sm:$0xff]   ;;  %3719 = vmatprep.subr.bf16.mxu1 %v4025_v2  ;;  %3657 = vmatprep.subr.bf16.mxu0 %v4027_v4  ;;  %v4030_v7 = vld [vmem:[%s6269_s2 + $0x88] sm:$0xff]   ;;  %v4033_v10 = vld [vmem:[%s6269_s2 + $0xd0] sm:$0xff]  }
  0x16   :  { %3720 = vmatpush3.bf16.msra.mxu1 %v4026_v3  ;;  %v4034_v11 = vld [vmem:[%s6269_s2 + $0x90] sm:$0xff]   ;;  %v4035_v12 = vld [vmem:[%s6269_s2 + $0x58] sm:$0xff]   ;;  %v4039_v16 = vld [vmem:[%s6269_s2 + $0x60] sm:$0xff]  }
  0x17   :  { %3721 = vmatprep.subr.bf16.mxu1 %v4029_v6  ;;  %v4036_v13 = vld [vmem:[%s6269_s2 + $0x18] sm:$0xff]   ;;  %v4040_v17 = vld [vmem:[%s6269_s2 + $0x20] sm:$0xff]   ;;  %v4043_v20 = vld [vmem:[%s6269_s2 + $0x68] sm:$0xff]  }
  0x18   :  { %3658 = vmatpush3.bf16.msra.mxu0 %v4028_v5  ;;  %v4037_v14 = vld [vmem:[%s6269_s2 + $0xd8] sm:$0xff]   ;;  %v4041_v18 = vld [vmem:[%s6269_s2 + $0xe0] sm:$0xff]   ;;  %v4044_v21 = vld [vmem:[%s6269_s2 + $0x28] sm:$0xff]  }
  0x19   :  { %3659 = vmatprep.subr.bf16.mxu0 %v4031_v8  ;;  %v4038_v15 = vld [vmem:[%s6269_s2 + $0x98] sm:$0xff]   ;;  %v4042_v19 = vld [vmem:[%s6269_s2 + $0xa0] sm:$0xff]   ;;  %v4045_v22 = vld [vmem:[%s6269_s2 + $0xe8] sm:$0xff]  }
  0x1a   :  { %3722 = vmatpush3.bf16.msra.mxu1 %v4030_v7  ;;  %v4046_v23 = vld [vmem:[%s6269_s2 + $0xa8] sm:$0xff]   ;;  %v4047_v24 = vld [vmem:[%s6269_s2 + $0x70] sm:$0xff]   ;;  %v4051_v28 = vld [vmem:[%s6269_s2 + $0x78] sm:$0xff]  }
  0x1b   :  { %3723 = vmatprep.subr.bf16.mxu1 %v4033_v10  ;;  %v4048_v25 = vld [vmem:[%s6269_s2 + $0x30] sm:$0xff]   ;;  %v4052_v29 = vld [vmem:[%s6269_s2 + $0x38] sm:$0xff]   ;;  %v4056_v32 = vld [vmem:[%s6267_s0 + $0x4] ss:$28 sps:$4 sm:$0xff]  }
  0x1c   :  { %3660 = vmatpush3.bf16.msra.mxu0 %v4032_v9  ;;  %v4049_v26 = vld [vmem:[%s6269_s2 + $0xf0] sm:$0xff]   ;;  %v4053_v30 = vld [vmem:[%s6269_s2 + $0xf8] sm:$0xff]   ;;  %891 = vmatprep.mubr.bf16.mxu0 %v4056_v32  ;;  %v4058_v34 = vld [vmem:[%s6269_s2 + $0x140] sm:$0xff]  }
  0x1d   :  { %3661 = vmatprep.subr.bf16.mxu0 %v4035_v12  ;;  %v4050_v27 = vld [vmem:[%s6269_s2 + $0xb0] sm:$0xff]   ;;  %v4054_v31 = vld [vmem:[%s6267_s0] ss:$28 sps:$4 sm:$0xff]   ;;  %v4059_v35 = vld [vmem:[%s6267_s0 + $0x8] ss:$28 sps:$4 sm:$0xff]  }
  0x1e   :  { %3724 = vmatpush3.bf16.msra.mxu1 %v4034_v11  ;;  %v4057_v33 = vld [vmem:[%s6269_s2 + $0xb8] sm:$0xff]   ;;  %v4061_v36 = vld [vmem:[%s6267_s0 + $0xc] ss:$28 sps:$4 sm:$0xff]   ;;  %v4062_v37 = vld [vmem:[%s6269_s2 + $0x100] sm:$0xff]  }
  0x1f   :  { %3725 = vmatprep.subr.bf16.mxu1 %v4037_v14  ;;  %988 = vmatprep.mubr.bf16.mxu1 %v4061_v36  ;;  %v4063_v38 = vld [vmem:[%s6267_s0 + $0x3c] ss:$28 sps:$4 sm:$0xff]   ;;  %v4066_v40 = vld [vmem:[%s6269_s2 + $0x148] sm:$0xff]   ;;  %v4067_v41 = vld [vmem:[%s6267_s0 + $0x44] ss:$28 sps:$4 sm:$0xff]  }
  0x20   :  { %3662 = vmatpush3.bf16.msra.mxu0 %v4036_v13  ;;  %v4065_v39 = vld [vmem:[%s6267_s0 + $0x38] ss:$28 sps:$4 sm:$0xff]   ;;  %v4069_v42 = vld [vmem:[%s6269_s2 + $0x108] sm:$0xff]   ;;  %v4070_v43 = vld [vmem:[%s6267_s0 + $0x40] ss:$28 sps:$4 sm:$0xff]  }
  0x21   :  { %3663 = vmatprep.subr.bf16.mxu0 %v4039_v16  ;;  %v4071_v44 = vld [vmem:[%s6269_s2 + $0x180] sm:$0xff]   ;;  %v4072_v45 = vld [vmem:[%s6267_s0 + $0x74] ss:$28 sps:$4 sm:$0xff]   ;;  %v4076_v47 = vld [vmem:[%s6267_s0 + $0x7c] ss:$28 sps:$4 sm:$0xff]  }
  0x22   :  { %3726 = vmatpush3.bf16.msra.mxu1 %v4038_v15  ;;  %v4075_v46 = vld [vmem:[%s6269_s2 + $0x150] sm:$0xff]   ;;  %v4080_v50 = vld [vmem:[%s6269_s2 + $0x188] sm:$0xff]   ;;  %v4084_v53 = vld [vmem:[%s6269_s2 + $0x158] sm:$0xff]  }
  0x23   :  { %3727 = vmatprep.subr.bf16.mxu1 %v4041_v18  ;;  %v4074_v48 = vld [vmem:[%s6267_s0 + $0x70] ss:$28 sps:$4 sm:$0xff]   ;;  %v4079_v52 = vld [vmem:[%s6267_s0 + $0x78] ss:$28 sps:$4 sm:$0xff]   ;;  %v4083_v57 = vld [vmem:[%s6267_s0 + $0xa8] ss:$28 sps:$4 sm:$0xff]  }
  0x24   :  { %3664 = vmatpush3.bf16.msra.mxu0 %v4040_v17  ;;  %v4078_v49 = vld [vmem:[%s6269_s2 + $0x110] sm:$0xff]   ;;  %v4081_v51 = vld [vmem:[%s6267_s0 + $0xac] ss:$28 sps:$4 sm:$0xff]   ;;  %v4087_v55 = vld [vmem:[%s6269_s2 + $0x118] sm:$0xff]  }
  0x25   :  { %3665 = vmatprep.subr.bf16.mxu0 %v4043_v20  ;;  %v4085_v54 = vld [vmem:[%s6267_s0 + $0xb4] ss:$28 sps:$4 sm:$0xff]   ;;  %v4093_v58 = vld [vmem:[%s6269_s2 + $0x160] sm:$0xff]   ;;  %v4094_v62 = vld [vmem:[%s6267_s0 + $0xec] ss:$28 sps:$4 sm:$0xff]  }
  0x26   :  { %3728 = vmatpush3.bf16.msra.mxu1 %v4042_v19  ;;  %v4089_v56 = vld [vmem:[%s6269_s2 + $0x190] sm:$0xff]   ;;  %v4090_v60 = vld [vmem:[%s6267_s0 + $0xe4] ss:$28 sps:$4 sm:$0xff]   ;;  %v4098_v63 = vld [vmem:[%s6269_s2 + $0x198] sm:$0xff]  }
  0x27   :  { %3729 = vmatprep.subr.bf16.mxu1 %v4045_v22  ;;  %v4088_v59 = vld [vmem:[%s6267_s0 + $0xb0] ss:$28 sps:$4 sm:$0xff]   ;;  %v4096_v61 = vld [vmem:[%s6269_s2 + $0x120] sm:$0xff]   ;;  %v4099_v2 = vld [vmem:[%s6267_s0 + $0x11c] ss:$28 sps:$4 sm:$0xff]  }
  0x28   :  { %3666 = vmatpush3.bf16.msra.mxu0 %v4044_v21  ;;  %v4102_v0 = vld [vmem:[%s6269_s2 + $0x168] sm:$0xff]   ;;  %v4092_v1 = vld [vmem:[%s6267_s0 + $0xe0] ss:$28 sps:$4 sm:$0xff]   ;;  %v4111_v7 = vld [vmem:[%s6269_s2 + $0x170] sm:$0xff]  }
  0x29   :  { %3667 = vmatprep.subr.bf16.mxu0 %v4047_v24  ;;  %v4105_v3 = vld [vmem:[%s6269_s2 + $0x128] sm:$0xff]   ;;  %v4107_v4 = vld [vmem:[%s6269_s2 + $0x1a0] sm:$0xff]   ;;  %v4114_v8 = vld [vmem:[%s6269_s2 + $0x130] sm:$0xff]  }
  0x2a   :  { %3730 = vmatpush3.bf16.msra.mxu1 %v4046_v23  ;;  %v4097_v5 = vld [vmem:[%s6267_s0 + $0xe8] ss:$28 sps:$4 sm:$0xff]   ;;  %v4101_v10 = vld [vmem:[%s6267_s0 + $0x118] ss:$28 sps:$4 sm:$0xff]   ;;  %v4106_v13 = vld [vmem:[%s6267_s0 + $0x120] ss:$28 sps:$4 sm:$0xff]  }
  0x2b   :  { %3731 = vmatprep.subr.bf16.mxu1 %v4049_v26  ;;  %v4103_v6 = vld [vmem:[%s6267_s0 + $0x124] ss:$28 sps:$4 sm:$0xff]   ;;  %v4116_v9 = vld [vmem:[%s6269_s2 + $0x1a8] sm:$0xff]   ;;  %v4108_v11 = vld [vmem:[%s6267_s0 + $0x154] ss:$28 sps:$4 sm:$0xff]  }
  0x2c   :  { %3668 = vmatpush3.bf16.msra.mxu0 %v4048_v25  ;;  %v4120_v12 = vld [vmem:[%s6269_s2 + $0x178] sm:$0xff]   ;;  %v4125_v16 = vld [vmem:[%s6269_s2 + $0x1b0] sm:$0xff]   ;;  %v4117_v19 = vld [vmem:[%s6267_s0 + $0x18c] ss:$28 sps:$4 sm:$0xff]  }
  0x2d   :  { %3669 = vmatprep.subr.bf16.mxu0 %v4051_v28  ;;  %v4123_v14 = vld [vmem:[%s6269_s2 + $0x138] sm:$0xff]   ;;  %v4110_v18 = vld [vmem:[%s6267_s0 + $0x150] ss:$28 sps:$4 sm:$0xff]   ;;  %v4119_v22 = vld [vmem:[%s6267_s0 + $0x188] ss:$28 sps:$4 sm:$0xff]  }
  0x2e   :  { %3732 = vmatpush3.bf16.msra.mxu1 %v4050_v27  ;;  %v4112_v15 = vld [vmem:[%s6267_s0 + $0x15c] ss:$28 sps:$4 sm:$0xff]   ;;  %v4121_v21 = vld [vmem:[%s6267_s0 + $0x194] ss:$28 sps:$4 sm:$0xff]   ;;  %v4132_v27 = vld [vmem:[%s6267_s0 + $0x4c] ss:$28 sps:$4 sm:$0xff]  }
  0x2f   :  { %3733 = vmatprep.subr.bf16.mxu1 %v4053_v30  ;;  %v4129_v17 = vld [vmem:[%s6269_s2 + $0x1b8] sm:$0xff]   ;;  %v4128_v23 = vld [vmem:[%s6267_s0 + $0x14] ss:$28 sps:$4 sm:$0xff]   ;;  %v4134_v30 = vld [vmem:[%s6267_s0 + $0x48] ss:$28 sps:$4 sm:$0xff]  }
  0x30   :  { %3670 = vmatpush3.bf16.msra.mxu0 %v4052_v29  ;;  %v4115_v20 = vld [vmem:[%s6267_s0 + $0x158] ss:$28 sps:$4 sm:$0xff]   ;;  %v4124_v24 = vld [vmem:[%s6267_s0 + $0x190] ss:$28 sps:$4 sm:$0xff]   ;;  %v4138_v29 = vld [vmem:[%s6267_s0 + $0x88] ss:$28 sps:$4 sm:$0xff]  }
  0x31   :  { %3783 = vmatprep.subr.bf16.mxu0 %v4058_v34  ;;  %v4130_v25 = vld [vmem:[%s6267_s0 + $0x18] ss:$28 sps:$4 sm:$0xff]   ;;  %v4126_v26 = vld [vmem:[%s6267_s0 + $0x10] ss:$28 sps:$4 sm:$0xff]   ;;  %v4139_v32 = vld [vmem:[%s6267_s0 + $0xc0] ss:$28 sps:$4 sm:$0xff]  }
  0x32   :  { %3734 = vmatpush3.bf16.msra.mxu1 %v4057_v33  ;;  %v4131_v28 = vld [vmem:[%s6267_s0 + $0x50] ss:$28 sps:$4 sm:$0xff]   ;;  %v4146_v33 = vld [vmem:[%s6267_s0 + $0xf8] ss:$28 sps:$4 sm:$0xff]   ;;  %v4137_v34 = vld [vmem:[%s6267_s0 + $0x80] ss:$28 sps:$4 sm:$0xff]  }
  0x33   :  { %892 = vmatmul.mubr.bf16.vlgmr.msra.gmra.mrb[0].mxu0 %v4054_v31  ;;  %3904 = vmatprep.subr.bf16.mxu1 %v4071_v44  ;;  %v4135_v31 = vld [vmem:[%s6267_s0 + $0x84] ss:$28 sps:$4 sm:$0xff]   ;;  %v4147_v36 = vld [vmem:[%s6267_s0 + $0x130] ss:$28 sps:$4 sm:$0xff]  }
  0x34   :  { %3784 = vmatpush3.bf16.msra.mxu0 %v4062_v37  ;;  %899 = vmatprep.mubr.bf16.mxu0 %v4063_v38  ;;  %v4154_v37 = vld [vmem:[%s6267_s0 + $0x168] ss:$28 sps:$4 sm:$0xff]   ;;  %v4142_v38 = vld [vmem:[%s6267_s0 + $0xb8] ss:$28 sps:$4 sm:$0xff]  }
  0x35   :  { %989 = vmatmul.mubr.bf16.vlgmr.msra.gmra.mrb[0].mxu1 %v4059_v35  ;;  %3785 = vmatprep.subr.bf16.mxu0 %v4066_v40  ;;  %v4140_v35 = vld [vmem:[%s6267_s0 + $0xbc] ss:$28 sps:$4 sm:$0xff]  }
  0x36   :  { %996 = vmatprep.mubr.bf16.mxu1 %v4067_v41  ;;  %3905 = vmatpush3.bf16.msra.mxu1 %v4071_v44  ;;  %v4155_v40 = vld [vmem:[%s6267_s0 + $0x1a0] ss:$28 sps:$4 sm:$0xff]   ;;  %v4145_v41 = vld [vmem:[%s6267_s0 + $0xf0] ss:$28 sps:$4 sm:$0xff]  }
  0x37   :  { %3906 = vmatprep.subr.bf16.mxu1 %v4080_v50  ;;  %v4151_v44 = vld [vmem:[%s6267_s0 + $0x164] ss:$28 sps:$4 sm:$0xff]  }
  0x38   :  { %3786 = vmatpush3.bf16.msra.mxu0 %v4069_v42  ;;  %v4148_v42 = vld [vmem:[%s6267_s0 + $0x12c] ss:$28 sps:$4 sm:$0xff]  }
  0x39   :  { %3787 = vmatprep.subr.bf16.mxu0 %v4075_v46  ;;  %v4156_v46 = vld [vmem:[%s6267_s0 + $0x19c] ss:$28 sps:$4 sm:$0xff]  }
  0x3a   :  { %3907 = vmatpush3.bf16.msra.mxu1 %v4080_v50  ;;  %v4161_v50 = vld [vmem:[%s6271_s4 + $0x10] sm:$0xff]  }
  0x3b   :  { %900 = vmatmul.mubr.bf16.gmra.mrb[4].mxu0 %v4065_v39  ;;  %3908 = vmatprep.subr.bf16.mxu1 %v4089_v56  ;;  %v4143_v39 = vld [vmem:[%s6267_s0 + $0xf4] ss:$28 sps:$4 sm:$0xff]  }
  0x3c   :  { %907 = vmatprep.mubr.bf16.mxu0 %v4072_v45  ;;  %3788 = vmatpush3.bf16.msra.mxu0 %v4078_v49  ;;  %v4153_v45 = vld [vmem:[%s6267_s0 + $0x160] ss:$28 sps:$4 sm:$0xff]   ;;  %v4160_v49 = vld [vmem:[%s6271_s4 + $0x8] sm:$0xff]  }
  0x3d   :  { %997 = vmatmul.mubr.bf16.gmra.mrb[4].mxu1 %v4070_v43  ;;  %3789 = vmatprep.subr.bf16.mxu0 %v4084_v53  ;;  %v4150_v43 = vld [vmem:[%s6267_s0 + $0x128] ss:$28 sps:$4 sm:$0xff]  }
  0x3e   :  { %1004 = vmatprep.mubr.bf16.mxu1 %v4076_v47  ;;  %3909 = vmatpush3.bf16.msra.mxu1 %v4089_v56  ;;  %v4158_v47 = vld [vmem:[%s6267_s0 + $0x198] ss:$28 sps:$4 sm:$0xff]   ;;  %v4164_v53 = vld [vmem:[%s6271_s4 + $0x28] sm:$0xff]  }
  0x3f   :  { %3910 = vmatprep.subr.bf16.mxu1 %v4098_v63 }
  0x40   :  { %3790 = vmatpush3.bf16.msra.mxu0 %v4087_v55  ;;  %v4166_v55 = vld [vmem:[%s6271_s4 + $0x38] sm:$0xff]  }
  0x41   :  { %3791 = vmatprep.subr.bf16.mxu0 %v4093_v58 }
  0x42   :  { %3911 = vmatpush3.bf16.msra.mxu1 %v4098_v63 }
  0x43   :  { %908 = vmatmul.mubr.bf16.gmra.mrb[8].mxu0 %v4074_v48  ;;  %3912 = vmatprep.subr.bf16.mxu1 %v4107_v4  ;;  %v4159_v48 = vld [vmem:[%s6271_s4] sm:$0xff]  }
  0x44   :  { %915 = vmatprep.mubr.bf16.mxu0 %v4081_v51  ;;  %3792 = vmatpush3.bf16.msra.mxu0 %v4096_v61  ;;  %v4162_v51 = vld [vmem:[%s6271_s4 + $0x18] sm:$0xff]  }
  0x45   :  { %1005 = vmatmul.mubr.bf16.gmra.mrb[8].mxu1 %v4079_v52  ;;  %3793 = vmatprep.subr.bf16.mxu0 %v4102_v0  ;;  %v4163_v52 = vld [vmem:[%s6271_s4 + $0x20] sm:$0xff]  }
  0x46   :  { %1012 = vmatprep.mubr.bf16.mxu1 %v4085_v54  ;;  %3913 = vmatpush3.bf16.msra.mxu1 %v4107_v4  ;;  %v4165_v54 = vld [vmem:[%s6271_s4 + $0x30] sm:$0xff]  }
  0x47   :  { %3914 = vmatprep.subr.bf16.mxu1 %v4116_v9 }
  0x48   :  { %3794 = vmatpush3.bf16.msra.mxu0 %v4105_v3 }
  0x49   :  { %3795 = vmatprep.subr.bf16.mxu0 %v4111_v7 }
  0x4a   :  { %3915 = vmatpush3.bf16.msra.mxu1 %v4116_v9 }
  0x4b   :  { %916 = vmatmul.mubr.bf16.gmra.mrb[12].mxu0 %v4083_v57  ;;  %3916 = vmatprep.subr.bf16.mxu1 %v4125_v16  ;;  %v5161_v57 = vld [vmem:[%s6270_s3] ss:$0 sm:$0xff] }
  0x4c   :  { %923 = vmatprep.mubr.bf16.mxu0 %v4090_v60  ;;  %3796 = vmatpush3.bf16.msra.mxu0 %v4114_v8 }
  0x4d   :  { %1013 = vmatmul.mubr.bf16.gmra.mrb[12].mxu1 %v4088_v59  ;;  %3797 = vmatprep.subr.bf16.mxu0 %v4120_v12 }
  0x4e   :  { %1020 = vmatprep.mubr.bf16.mxu1 %v4094_v62  ;;  %3917 = vmatpush3.bf16.msra.mxu1 %v4125_v16 }
  0x4f   :  { %3918 = vmatprep.subr.bf16.mxu1 %v4129_v17 }
  0x50   :  { %3798 = vmatpush3.bf16.msra.mxu0 %v4123_v14 }
  0x52   :  { %3919 = vmatpush3.bf16.msra.mxu1 %v4129_v17 }
  0x53   :  { %924 = vmatmul.mubr.bf16.gmra.mrb[16].mxu0 %v4092_v1  ;;  %3936 = vmatprep.subr.bf16.mxu1 %v4159_v48 }
  0x54   :  { %931 = vmatprep.mubr.bf16.mxu0 %v4099_v2 }
  0x55   :  { %1021 = vmatmul.mubr.bf16.gmra.mrb[16].mxu1 %v4097_v5 }
  0x56   :  { %1028 = vmatprep.mubr.bf16.mxu1 %v4103_v6 }
  0x5b   :  { %932 = vmatmul.mubr.bf16.gmra.mrb[20].mxu0 %v4101_v10 }
  0x5c   :  { %939 = vmatprep.mubr.bf16.mxu0 %v4108_v11 }
  0x5d   :  { %1029 = vmatmul.mubr.bf16.gmra.mrb[20].mxu1 %v4106_v13 }
  0x5e   :  { %1036 = vmatprep.mubr.bf16.mxu1 %v4112_v15 }
  0x63   :  { %940 = vmatmul.mubr.bf16.gmra.mrb[24].mxu0 %v4110_v18 }
  0x64   :  { %947 = vmatprep.mubr.bf16.mxu0 %v4117_v19 }
  0x65   :  { %1037 = vmatmul.mubr.bf16.gmra.mrb[24].mxu1 %v4115_v20 }
  0x66   :  { %1044 = vmatprep.mubr.bf16.mxu1 %v4121_v21 }
  0x6b   :  { %948 = vmatmul.mubr.bf16.gmra.mrb[28].mxu0 %v4119_v22 }
  0x6c   :  { %1085 = vmatprep.mubr.bf16.mxu0 %v4128_v23 }
  0x6d   :  { %1045 = vmatmul.mubr.bf16.gmra.mrb[28].mxu1 %v4124_v24 }
  0x6e   :  { %3920 = vmatprep.mubr.bf16.mxu1 %v4130_v25 }
  0x73   :  { %1086 = vmatmul.mubr.bf16.vlgmr.msra.gmra.mrb[32].mxu0 %v4126_v26 }
  0x74   :  { %1093 = vmatprep.mubr.bf16.mxu0 %v4132_v27 }
  0x75   :  { %3921 = vmatmul.mubr.bf16.vlgmr.msra.gmra.mrb[32].mxu1 %v4131_v28 }
  0x76   :  { %3924 = vmatprep.mubr.bf16.mxu1 %v4138_v29  ;;  %3937 = vmatpush3.bf16.msra.mxu1 %v4159_v48 }
  0x77   :  { %3938 = vmatprep.subr.bf16.mxu1 %v4160_v49 }
  0x7a   :  { %3939 = vmatpush3.bf16.msra.mxu1 %v4160_v49 }
  0x7b   :  { %1094 = vmatmul.mubr.bf16.gmra.mrb[36].mxu0 %v4134_v30  ;;  %3940 = vmatprep.subr.bf16.mxu1 %v4161_v50 }
  0x7c   :  { %1101 = vmatprep.mubr.bf16.mxu0 %v4135_v31 }
  0x7d   :  { %3925 = vmatmul.mubr.bf16.gmra.mrb[36].mxu1 %v4139_v32 }
  0x7e   :  { %3928 = vmatprep.mubr.bf16.mxu1 %v4146_v33  ;;  %3941 = vmatpush3.bf16.msra.mxu1 %v4161_v50 }
  0x7f   :  { %3942 = vmatprep.subr.bf16.mxu1 %v4162_v51 }
  0x82   :  { %3943 = vmatpush3.bf16.msra.mxu1 %v4162_v51 }
  0x83   :  { %1102 = vmatmul.mubr.bf16.gmra.mrb[40].mxu0 %v4137_v34  ;;  %3944 = vmatprep.subr.bf16.mxu1 %v4163_v52 }
  0x84   :  { %1109 = vmatprep.mubr.bf16.mxu0 %v4140_v35 }
  0x85   :  { %3929 = vmatmul.mubr.bf16.gmra.mrb[40].mxu1 %v4147_v36 }
  0x86   :  { %3932 = vmatprep.mubr.bf16.mxu1 %v4154_v37  ;;  %3945 = vmatpush3.bf16.msra.mxu1 %v4163_v52 }
  0x87   :  { %3946 = vmatprep.subr.bf16.mxu1 %v4164_v53 }
  0x8a   :  { %3947 = vmatpush3.bf16.msra.mxu1 %v4164_v53 }
  0x8b   :  { %1110 = vmatmul.mubr.bf16.gmra.mrb[44].mxu0 %v4142_v38  ;;  %3948 = vmatprep.subr.bf16.mxu1 %v4165_v54 }
  0x8c   :  { %1117 = vmatprep.mubr.bf16.mxu0 %v4143_v39 }
  0x8d   :  { %3933 = vmatmul.mubr.bf16.gmra.mrb[44].mxu1 %v4155_v40 }
  0x8e   :  { %3949 = vmatpush3.bf16.msra.mxu1 %v4165_v54 }
  0x8f   :  { %3950 = vmatprep.subr.bf16.mxu1 %v4166_v55 }
  0x92   :  { %3951 = vmatpush3.bf16.msra.mxu1 %v4166_v55 }
  0x93   :  { %1118 = vmatmul.mubr.bf16.gmra.mrb[48].mxu0 %v4145_v41 }
  0x94   :  { %1125 = vmatprep.mubr.bf16.mxu0 %v4148_v42 }
  0x9b   :  { %1126 = vmatmul.mubr.bf16.gmra.mrb[52].mxu0 %v4150_v43 }
  0x9c   :  { %1133 = vmatprep.mubr.bf16.mxu0 %v4151_v44 }
  0xa3   :  { %1134 = vmatmul.mubr.bf16.gmra.mrb[56].mxu0 %v4153_v45 }
  0xa4   :  { %1141 = vmatprep.mubr.bf16.mxu0 %v4156_v46 }
  0xab   :  { %1142 = vmatmul.mubr.bf16.gmra.mrb[60].mxu0 %v4158_v47 }
 0x106   :  { %v3671_v56 = vpop.f32.mrb[0].mxu0 }
 0x107   :  { %v3672_v58 = vpop.f32.mrb[1].mxu0 }
 0x108   :  { %v3673_v59 = vadd.f32 %v3672_v58, %v3671_v56  ;;  %v3674_v60 = vpop.f32.mrb[2].mxu0  ;;  %v3735_v61 = vpop.f32.mrb[0].mxu1 }
 0x109   :  { %v3675_v62 = vpop.f32.mrb[3].mxu0  ;;  %v3736_v1 = vpop.f32.mrb[1].mxu1 }
 0x10a   :  { %v894_v63 = vadd.f32 %v3673_v59, %v5161_v57  ;;  %v3676_v0 = vadd.f32 %v3675_v62, %v3674_v60  ;;  %v3737_v2 = vadd.f32 %v3736_v1, %v3735_v61  ;;  %v3738_v3 = vpop.f32.mrb[2].mxu1 }
 0x10b   :  { %v3739_v5 = vpop.f32.mrb[3].mxu1 }
 0x10c   :  { %v897_v4 = vadd.f32 %v3676_v0, %v5161_v57  ;;  %v5165_v6 = vadd.f32 %v3737_v2, %v894_v63  ;;  %v3740_v7 = vadd.f32 %v3739_v5, %v3738_v3 }
 0x10e   :  { %v3677_v8 = vpop.f32.mrb[4].mxu0  ;;  %v5167_v9 = vadd.f32 %v3740_v7, %v897_v4 }
 0x10f   :  { %v3678_v10 = vpop.f32.mrb[5].mxu0 }
 0x110   :  { %v3679_v11 = vadd.f32 %v3678_v10, %v3677_v8  ;;  %v3680_v12 = vpop.f32.mrb[6].mxu0  ;;  %v3741_v13 = vpop.f32.mrb[4].mxu1 }
 0x111   :  { %v3681_v14 = vpop.f32.mrb[7].mxu0  ;;  %v3742_v17 = vpop.f32.mrb[5].mxu1 }
 0x112   :  { %v902_v15 = vadd.f32 %v3679_v11, %v5161_v57  ;;  %v3682_v16 = vadd.f32 %v3681_v14, %v3680_v12  ;;  %v3743_v18 = vadd.f32 %v3742_v17, %v3741_v13  ;;  %v3744_v19 = vpop.f32.mrb[6].mxu1 }
 0x113   :  { %v3745_v21 = vpop.f32.mrb[7].mxu1 }
 0x114   :  { %v905_v20 = vadd.f32 %v3682_v16, %v5161_v57  ;;  %v5171_v22 = vadd.f32 %v3743_v18, %v902_v15  ;;  %v3746_v23 = vadd.f32 %v3745_v21, %v3744_v19 }
 0x116   :  { %v3683_v24 = vpop.f32.mrb[8].mxu0  ;;  %v5173_v25 = vadd.f32 %v3746_v23, %v905_v20 }
 0x117   :  { %v3684_v26 = vpop.f32.mrb[9].mxu0 }
 0x118   :  { %v3685_v27 = vadd.f32 %v3684_v26, %v3683_v24  ;;  %v3686_v28 = vpop.f32.mrb[10].mxu0  ;;  %v3747_v29 = vpop.f32.mrb[8].mxu1 }
 0x119   :  { %v3687_v30 = vpop.f32.mrb[11].mxu0  ;;  %v3748_v33 = vpop.f32.mrb[9].mxu1 }
 0x11a   :  { %v910_v31 = vadd.f32 %v3685_v27, %v5161_v57  ;;  %v3688_v32 = vadd.f32 %v3687_v30, %v3686_v28  ;;  %v3749_v34 = vadd.f32 %v3748_v33, %v3747_v29  ;;  %v3750_v35 = vpop.f32.mrb[10].mxu1 }
 0x11b   :  { %v3751_v37 = vpop.f32.mrb[11].mxu1 }
 0x11c   :  { %v913_v36 = vadd.f32 %v3688_v32, %v5161_v57  ;;  %v5177_v38 = vadd.f32 %v3749_v34, %v910_v31  ;;  %v3752_v39 = vadd.f32 %v3751_v37, %v3750_v35 }
 0x11e   :  { %v3689_v40 = vpop.f32.mrb[12].mxu0  ;;  %v5179_v41 = vadd.f32 %v3752_v39, %v913_v36 }
 0x11f   :  { %v3690_v42 = vpop.f32.mrb[13].mxu0 }
 0x120   :  { %v3691_v43 = vadd.f32 %v3690_v42, %v3689_v40  ;;  %v3692_v44 = vpop.f32.mrb[14].mxu0  ;;  %v3753_v45 = vpop.f32.mrb[12].mxu1 }
 0x121   :  { %v3693_v46 = vpop.f32.mrb[15].mxu0  ;;  %v3754_v49 = vpop.f32.mrb[13].mxu1 }
 0x122   :  { %v918_v47 = vadd.f32 %v3691_v43, %v5161_v57  ;;  %v3694_v48 = vadd.f32 %v3693_v46, %v3692_v44  ;;  %v3755_v50 = vadd.f32 %v3754_v49, %v3753_v45  ;;  %v3756_v51 = vpop.f32.mrb[14].mxu1 }
 0x123   :  { %v3757_v53 = vpop.f32.mrb[15].mxu1 }
 0x124   :  { %v921_v52 = vadd.f32 %v3694_v48, %v5161_v57  ;;  %v5183_v54 = vadd.f32 %v3755_v50, %v918_v47  ;;  %v3758_v55 = vadd.f32 %v3757_v53, %v3756_v51 }
 0x126   :  { %v3695_v56 = vpop.f32.mrb[16].mxu0  ;;  %v5185_v58 = vadd.f32 %v3758_v55, %v921_v52 }
 0x127   :  { %v3696_v59 = vpop.f32.mrb[17].mxu0 }
 0x128   :  { %v3697_v60 = vadd.f32 %v3696_v59, %v3695_v56  ;;  %v3698_v61 = vpop.f32.mrb[18].mxu0  ;;  %v3759_v62 = vpop.f32.mrb[16].mxu1 }
 0x129   :  { %v3699_v63 = vpop.f32.mrb[19].mxu0  ;;  %v3760_v2 = vpop.f32.mrb[17].mxu1 }
 0x12a   :  { %v926_v0 = vadd.f32 %v3697_v60, %v5161_v57  ;;  %v3700_v1 = vadd.f32 %v3699_v63, %v3698_v61  ;;  %v3761_v3 = vadd.f32 %v3760_v2, %v3759_v62  ;;  %v3762_v4 = vpop.f32.mrb[18].mxu1 }
 0x12b   :  { %v3763_v7 = vpop.f32.mrb[19].mxu1 }
 0x12c   :  { %v929_v5 = vadd.f32 %v3700_v1, %v5161_v57  ;;  %v5189_v8 = vadd.f32 %v3761_v3, %v926_v0  ;;  %v3764_v10 = vadd.f32 %v3763_v7, %v3762_v4 }
 0x12e   :  { %v3701_v11 = vpop.f32.mrb[20].mxu0  ;;  %v5191_v12 = vadd.f32 %v3764_v10, %v929_v5 }
 0x12f   :  { %v3702_v13 = vpop.f32.mrb[21].mxu0 }
 0x130   :  { %v3703_v14 = vadd.f32 %v3702_v13, %v3701_v11  ;;  %v3704_v15 = vpop.f32.mrb[22].mxu0  ;;  %v3765_v16 = vpop.f32.mrb[20].mxu1 }
 0x131   :  { %v3705_v17 = vpop.f32.mrb[23].mxu0  ;;  %v3766_v20 = vpop.f32.mrb[21].mxu1 }
 0x132   :  { %v934_v18 = vadd.f32 %v3703_v14, %v5161_v57  ;;  %v3706_v19 = vadd.f32 %v3705_v17, %v3704_v15  ;;  %v3767_v21 = vadd.f32 %v3766_v20, %v3765_v16  ;;  %v3768_v23 = vpop.f32.mrb[22].mxu1 }
 0x133   :  { %v3769_v26 = vpop.f32.mrb[23].mxu1 }
 0x134   :  { %v937_v24 = vadd.f32 %v3706_v19, %v5161_v57  ;;  %v5195_v27 = vadd.f32 %v3767_v21, %v934_v18  ;;  %v3770_v28 = vadd.f32 %v3769_v26, %v3768_v23 }
 0x136   :  { %v3707_v29 = vpop.f32.mrb[24].mxu0  ;;  %v5197_v30 = vadd.f32 %v3770_v28, %v937_v24 }
 0x137   :  { %v3708_v31 = vpop.f32.mrb[25].mxu0 }
 0x138   :  { %v3709_v32 = vadd.f32 %v3708_v31, %v3707_v29  ;;  %v3710_v33 = vpop.f32.mrb[26].mxu0  ;;  %v3771_v34 = vpop.f32.mrb[24].mxu1 }
 0x139   :  { %v3711_v35 = vpop.f32.mrb[27].mxu0  ;;  %v3772_v39 = vpop.f32.mrb[25].mxu1 }
 0x13a   :  { %v942_v36 = vadd.f32 %v3709_v32, %v5161_v57  ;;  %v3712_v37 = vadd.f32 %v3711_v35, %v3710_v33  ;;  %v3773_v40 = vadd.f32 %v3772_v39, %v3771_v34  ;;  %v3774_v42 = vpop.f32.mrb[26].mxu1 }
 0x13b   :  { %v3775_v44 = vpop.f32.mrb[27].mxu1 }
 0x13c   :  { %v945_v43 = vadd.f32 %v3712_v37, %v5161_v57  ;;  %v5201_v45 = vadd.f32 %v3773_v40, %v942_v36  ;;  %v3776_v46 = vadd.f32 %v3775_v44, %v3774_v42 }
 0x13e   :  { %v3713_v47 = vpop.f32.mrb[28].mxu0  ;;  %v5203_v48 = vadd.f32 %v3776_v46, %v945_v43 }
 0x13f   :  { %v3714_v49 = vpop.f32.mrb[29].mxu0 }
 0x140   :  { %v3715_v50 = vadd.f32 %v3714_v49, %v3713_v47  ;;  %v3716_v51 = vpop.f32.mrb[30].mxu0  ;;  %v3777_v52 = vpop.f32.mrb[28].mxu1 }
 0x141   :  { %v3717_v53 = vpop.f32.mrb[31].mxu0  ;;  %v3778_v59 = vpop.f32.mrb[29].mxu1 }
 0x142   :  { %v950_v55 = vadd.f32 %v3715_v50, %v5161_v57  ;;  %v3718_v56 = vadd.f32 %v3717_v53, %v3716_v51  ;;  %v3779_v60 = vadd.f32 %v3778_v59, %v3777_v52  ;;  %v3780_v61 = vpop.f32.mrb[30].mxu1 }
 0x143   :  { %v3781_v63 = vpop.f32.mrb[31].mxu1 }
 0x144   :  { %v953_v62 = vadd.f32 %v3718_v56, %v5161_v57  ;;  %v5207_v0 = vadd.f32 %v3779_v60, %v950_v55  ;;  %v3782_v1 = vadd.f32 %v3781_v63, %v3780_v61 }
 0x146   :  { %v3799_v2 = vpop.f32.mrb[32].mxu0  ;;  %v5209_v3 = vadd.f32 %v3782_v1, %v953_v62 }
 0x147   :  { %v3800_v4 = vpop.f32.mrb[33].mxu0 }
 0x148   :  { %v3801_v5 = vadd.f32 %v3800_v4, %v3799_v2  ;;  %v3802_v7 = vpop.f32.mrb[34].mxu0  ;;  %v3922_v11 = vpop.f32.mrb[32].mxu1 }
 0x149   :  { %v3803_v10 = vpop.f32.mrb[35].mxu0  ;;  %v1184_v15 = vpop.f32.mrb[33].mxu1 }
 0x14a   :  { %v3804_v13 = vadd.f32 %v3803_v10, %v3802_v7  ;;  %v1088_v14 = vadd.f32 %v3801_v5, %v5165_v6  ;;  %v3923_v16 = vpop.f32.mrb[34].mxu1 }
 0x14b   :  { %v1187_v18 = vpop.f32.mrb[35].mxu1 }
 0x14c   :  { %v1185_v17 = vadd.f32 %v1184_v15, %v1088_v14  ;;  %v1091_v57 = vadd.f32 %v3804_v13, %v5167_v9 }
 0x14e   :  { %v1188_v19 = vadd.f32 %v1187_v18, %v1091_v57  ;;  %v3805_v20 = vpop.f32.mrb[36].mxu0  ;;  %v1247_v23 = vmax.f32 %v1185_v17, 0.0 }
 0x14f   :  { %v3806_v21 = vpop.f32.mrb[37].mxu0 }
 0x150   :  { %v1248_v24 = vmax.f32 %v1188_v19, 0.0  ;;  %v3807_v26 = vadd.f32 %v3806_v21, %v3805_v20  ;;  %v3808_v28 = vpop.f32.mrb[38].mxu0  ;;  %v3926_v31 = vpop.f32.mrb[36].mxu1 }
 0x151   :  { %v3809_v29 = vpop.f32.mrb[39].mxu0  ;;  %v1200_v6 = vpop.f32.mrb[37].mxu1 }
 0x152   :  { %v1263_v32 = vpack.c.bf16 %v1248_v24, %v1247_v23  ;;  %v1096_v33 = vadd.f32 %v3807_v26, %v5171_v22  ;;  %v3810_v34 = vadd.f32 %v3809_v29, %v3808_v28  ;;  %v3927_v35 = vpop.f32.mrb[38].mxu1 }
 0x153   :  { %v1203_v9 = vpop.f32.mrb[39].mxu1 }
 0x154   :  { %v1193_v36 = vadd.f32 %v3922_v11, %v1096_v33  ;;  %v1099_v37 = vadd.f32 %v3810_v34, %v5173_v25  ;;  %3952 = vmatprep.mubr.bf16.mxu1 %v1263_v32 }
 0x156   :  { %v1196_v39 = vadd.f32 %v3923_v16, %v1099_v37  ;;  %v3811_v40 = vpop.f32.mrb[40].mxu0  ;;  %v1249_v43 = vmax.f32 %v1193_v36, 0.0 }
 0x157   :  { %v3812_v42 = vpop.f32.mrb[41].mxu0 }
 0x158   :  { %v1250_v44 = vmax.f32 %v1196_v39, 0.0  ;;  %v3813_v46 = vadd.f32 %v3812_v42, %v3811_v40  ;;  %v3814_v47 = vpop.f32.mrb[42].mxu0  ;;  %v3930_v50 = vpop.f32.mrb[40].mxu1 }
 0x159   :  { %v3815_v49 = vpop.f32.mrb[43].mxu0  ;;  %v1216_v53 = vpop.f32.mrb[41].mxu1 }
 0x15a   :  { %v1264_v51 = vpack.c.bf16 %v1250_v44, %v1249_v43  ;;  %v3816_v52 = vadd.f32 %v3815_v49, %v3814_v47  ;;  %v1104_v22 = vadd.f32 %v3813_v46, %v5177_v38  ;;  %v3931_v55 = vpop.f32.mrb[42].mxu1 }
 0x15b   :  { %v1219_v59 = vpop.f32.mrb[43].mxu1 }
 0x15c   :  { %v1201_v56 = vadd.f32 %v1200_v6, %v1104_v22  ;;  %3953 = vmatmul.mubr.bf16.vlgmr.msra.gmra.mrb[48].mxu1 %v1264_v51  ;;  %v1107_v25 = vadd.f32 %v3816_v52, %v5179_v41 }
 0x15e   :  { %v1204_v60 = vadd.f32 %v1203_v9, %v1107_v25  ;;  %v3817_v61 = vpop.f32.mrb[44].mxu0  ;;  %v1251_v63 = vmax.f32 %v1201_v56, 0.0 }
 0x15f   :  { %v3818_v62 = vpop.f32.mrb[45].mxu0 }
 0x160   :  { %v1252_v1 = vmax.f32 %v1204_v60, 0.0  ;;  %v3819_v2 = vadd.f32 %v3818_v62, %v3817_v61  ;;  %v3820_v4 = vpop.f32.mrb[46].mxu0  ;;  %v5217_v7 = vpop.f32.mrb[44].mxu1 }
 0x161   :  { %v3821_v5 = vpop.f32.mrb[47].mxu0  ;;  %v1232_v13 = vpop.f32.mrb[45].mxu1 }
 0x162   :  { %v1265_v10 = vpack.c.bf16 %v1252_v1, %v1251_v63  ;;  %v1112_v38 = vadd.f32 %v3819_v2, %v5183_v54  ;;  %v3822_v11 = vadd.f32 %v3821_v5, %v3820_v4  ;;  %v3935_v14 = vpop.f32.mrb[46].mxu1 }
 0x163   :  { %v1235_v16 = vpop.f32.mrb[47].mxu1 }
 0x164   :  { %v1209_v15 = vadd.f32 %v3926_v31, %v1112_v38  ;;  %v1115_v41 = vadd.f32 %v3822_v11, %v5185_v58  ;;  %3956 = vmatprep.mubr.bf16.mxu1 %v1265_v10 }
 0x166   :  { %v1212_v17 = vadd.f32 %v3927_v35, %v1115_v41  ;;  %v3823_v57 = vpop.f32.mrb[48].mxu0  ;;  %v1253_v19 = vmax.f32 %v1209_v15, 0.0 }
 0x167   :  { %v3824_v18 = vpop.f32.mrb[49].mxu0 }
 0x168   :  { %v1254_v20 = vmax.f32 %v1212_v17, 0.0  ;;  %v3825_v21 = vadd.f32 %v3824_v18, %v3823_v57  ;;  %v3826_v23 = vpop.f32.mrb[50].mxu0 }
 0x169   :  { %v3827_v24 = vpop.f32.mrb[51].mxu0 }
 0x16a   :  { %v3828_v26 = vadd.f32 %v3827_v24, %v3826_v23  ;;  %v1120_v28 = vadd.f32 %v3825_v21, %v5189_v8  ;;  %v1266_v54 = vpack.c.bf16 %v1254_v20, %v1253_v19 }
 0x16c   :  { %v1217_v29 = vadd.f32 %v1216_v53, %v1120_v28  ;;  %3957 = vmatmul.mubr.bf16.gmra.mrb[52].mxu1 %v1266_v54  ;;  %v1123_v31 = vadd.f32 %v3828_v26, %v5191_v12 }
 0x16e   :  { %v1220_v32 = vadd.f32 %v1219_v59, %v1123_v31  ;;  %v3829_v58 = vpop.f32.mrb[52].mxu0  ;;  %v1255_v34 = vmax.f32 %v1217_v29, 0.0 }
 0x16f   :  { %v3830_v33 = vpop.f32.mrb[53].mxu0 }
 0x170   :  { %v1256_v6 = vmax.f32 %v1220_v32, 0.0  ;;  %v3831_v35 = vadd.f32 %v3830_v33, %v3829_v58  ;;  %v3832_v36 = vpop.f32.mrb[54].mxu0 }
 0x171   :  { %v3833_v37 = vpop.f32.mrb[55].mxu0 }
 0x172   :  { %v1267_v9 = vpack.c.bf16 %v1256_v6, %v1255_v34  ;;  %v1128_v39 = vadd.f32 %v3831_v35, %v5195_v27  ;;  %v3834_v40 = vadd.f32 %v3833_v37, %v3832_v36 }
 0x174   :  { %v1225_v42 = vadd.f32 %v3930_v50, %v1128_v39  ;;  %v1131_v8 = vadd.f32 %v3834_v40, %v5197_v30  ;;  %3960 = vmatprep.mubr.bf16.mxu1 %v1267_v9 }
 0x176   :  { %v1228_v43 = vadd.f32 %v3931_v55, %v1131_v8  ;;  %v3835_v44 = vpop.f32.mrb[56].mxu0  ;;  %v1257_v12 = vmax.f32 %v1225_v42, 0.0  ;;  %v4168_v8 = vld [vmem:[#allocation2] ss:$28 sps:$4 sm:$0xff]  }
 0x177   :  { %v3836_v46 = vpop.f32.mrb[57].mxu0 }
 0x178   :  { %v1258_v47 = vmax.f32 %v1228_v43, 0.0  ;;  %v3837_v49 = vadd.f32 %v3836_v46, %v3835_v44  ;;  %v3838_v51 = vpop.f32.mrb[58].mxu0  ;;  %v4170_v43 = vld [vmem:[#allocation2 + $0x4] ss:$28 sps:$4 sm:$0xff]   ;;  %v4173_v46 = vld [vmem:[#allocation2 + $0xc] ss:$28 sps:$4 sm:$0xff]  }
 0x179   :  { %v3839_v52 = vpop.f32.mrb[59].mxu0  ;;  %2109 = vmatprep.subr.bf16.mxu1 %v4170_v43 }
 0x17a   :  { %v3840_v22 = vadd.f32 %v3839_v52, %v3838_v51  ;;  %v1136_v53 = vadd.f32 %v3837_v49, %v5201_v45  ;;  %v1268_v56 = vpack.c.bf16 %v1258_v47, %v1257_v12  ;;  %v4176_v12 = vld [vmem:[#allocation2 + $0x3c] ss:$28 sps:$4 sm:$0xff]   ;;  %2110 = vmatpush1.bf16.msra.mxu1 %v4168_v8  ;;  %v4182_v49 = vld [vmem:[#allocation2 + $0x74] ss:$28 sps:$4 sm:$0xff]   ;;  %v4188_v52 = vld [vmem:[#allocation2 + $0xac] ss:$28 sps:$4 sm:$0xff]  }
 0x17b   :  { %v4174_v47 = vld [vmem:[#allocation2 + $0x38] ss:$28 sps:$4 sm:$0xff]   ;;  %2111 = vmatprep.subr.bf16.mxu1 %v4176_v12  ;;  %v4180_v51 = vld [vmem:[#allocation2 + $0x70] ss:$28 sps:$4 sm:$0xff]  }
 0x17c   :  { %v1233_v25 = vadd.f32 %v1232_v13, %v1136_v53  ;;  %3961 = vmatmul.mubr.bf16.gmra.mrb[56].mxu1 %v1268_v56  ;;  %v1139_v27 = vadd.f32 %v3840_v22, %v5203_v48  ;;  %v4167_v13 = vld [vmem:[%s6273_s6] sm:$0xff]   ;;  %s4724_s6 = smov 112  }
 0x17d   :  { %3968 = vmatprep.subr.bf16.mxu0 %v4167_v13  ;;  %v4186_v22 = vld [vmem:[#allocation2 + $0xa8] ss:$28 sps:$4 sm:$0xff]   ;;  %v4192_v56 = vld [vmem:[#allocation2 + $0xe0] ss:$28 sps:$4 sm:$0xff]  }
 0x17e   :  { %v1236_v50 = vadd.f32 %v1235_v16, %v1139_v27  ;;  %v3841_v59 = vpop.f32.mrb[60].mxu0  ;;  %v1259_v60 = vmax.f32 %v1233_v25, 0.0  ;;  %3969 = vmatpush3.bf16.msra.mxu0 %v4167_v13  ;;  %2112 = vmatpush1.bf16.msra.mxu1 %v4174_v47  ;;  %v4194_v53 = vld [vmem:[#allocation2 + $0xe4] ss:$28 sps:$4 sm:$0xff]   ;;  %v4200_v25 = vld [vmem:[#allocation2 + $0x11c] ss:$28 sps:$4 sm:$0xff]  }
 0x17f   :  { %v3842_v30 = vpop.f32.mrb[61].mxu0  ;;  %2222 = vmatprep.subr.bf16.mxu0 %v4173_v46  ;;  %2113 = vmatprep.subr.bf16.mxu1 %v4182_v49  ;;  %v4198_v27 = vld [vmem:[#allocation2 + $0x118] ss:$28 sps:$4 sm:$0xff]   ;;  %v4171_v13 = vld [vmem:[#allocation2 + $0x8] ss:$28 sps:$4 sm:$0xff]  }
 0x180   :  { %v1260_v55 = vmax.f32 %v1236_v50, 0.0  ;;  %v3843_v61 = vadd.f32 %v3842_v30, %v3841_v59  ;;  %v3844_v62 = vpop.f32.mrb[62].mxu0  ;;  %v1439_v59 = vld [vmem:[%s6268_s1] sm:$0xff] }
 0x181   :  { %v3845_v63 = vpop.f32.mrb[63].mxu0  ;;  %v4195_v47 = vld [vmem:[#allocation2 + $0xe8] ss:$28 sps:$4 sm:$0xff]  }
 0x182   :  { %v1269_v1 = vpack.c.bf16 %v1260_v55, %v1259_v60  ;;  %v1144_v2 = vadd.f32 %v3843_v61, %v5207_v0  ;;  %v3846_v4 = vadd.f32 %v3845_v63, %v3844_v62  ;;  %v3468_v0 = vld [vmem:[%s6272_s5] ss:$0 sm:$0xff]  ;;  %2114 = vmatpush1.bf16.msra.mxu1 %v4180_v51  ;;  %v1441_v60 = vld [vmem:[%s6268_s1 + $0x10] sm:$0xff]  ;;  %v1442_v55 = vld [vmem:[%s6268_s1 + $0x18] sm:$0xff] }
 0x183   :  { %2115 = vmatprep.subr.bf16.mxu1 %v4188_v52  ;;  %v1440_v61 = vld [vmem:[%s6268_s1 + $0x8] sm:$0xff]  ;;  %v4203_v49 = vld [vmem:[#allocation2 + $0x124] ss:$28 sps:$4 sm:$0xff]  }
 0x184   :  { %v1241_v5 = vadd.f32 %v5217_v7, %v1144_v2  ;;  %v1147_v45 = vadd.f32 %v3846_v4, %v5209_v3  ;;  %3964 = vmatprep.mubr.bf16.mxu1 %v1269_v1  ;;  %v4201_v51 = vld [vmem:[#allocation2 + $0x120] ss:$28 sps:$4 sm:$0xff]  }
 0x186   :  { %v1244_v10 = vadd.f32 %v3935_v14, %v1147_v45  ;;  %v1261_v38 = vmax.f32 %v1241_v5, 0.0  ;;  %2116 = vmatpush1.bf16.msra.mxu1 %v4186_v22 }
 0x187   :  { %2117 = vmatprep.subr.bf16.mxu1 %v4194_v53  ;;  %v1449_v53 = vld [vmem:[%s6268_s1 + $0x50] sm:$0xff] }
 0x188   :  { %v1262_v48 = vmax.f32 %v1244_v10, 0.0 }
 0x18a   :  { %v1270_v11 = vpack.c.bf16 %v1262_v48, %v1261_v38  ;;  %2118 = vmatpush1.bf16.msra.mxu1 %v4192_v56 }
 0x18b   :  { %2119 = vmatprep.subr.bf16.mxu1 %v4200_v25 }
 0x18c   :  { %3965 = vmatmul.mubr.bf16.gmra.mrb[60].mxu1 %v1270_v11 }
 0x18e   :  { %2120 = vmatpush1.bf16.msra.mxu1 %v4198_v27  ;;  %v1450_v27 = vld [vmem:[%s6268_s1 + $0x58] sm:$0xff] }
 0x22f   :  { %v3954_v15 = vpop.f32.mrb[48].mxu1 }
 0x230   :  { %v5236_v7 = vadd.f32 %v3954_v15, %v3468_v0  ;;  %v1376_v3 = vpop.f32.mrb[49].mxu1  ;;  %v4179_v15 = vld [vmem:[#allocation2 + $0x44] ss:$28 sps:$4 sm:$0xff]  }
 0x231   :  { %v5238_v14 = vadd.f32 %v3468_v0, %v1376_v3  ;;  %v3955_v41 = vpop.f32.mrb[50].mxu1  ;;  %v4177_v3 = vld [vmem:[#allocation2 + $0x40] ss:$28 sps:$4 sm:$0xff]  }
 0x232   :  { %3332 = vst.msk [vmem:[%s6278_s11 + $0x10] sm:$0xff] %vm3329_vm0, %v5236_v7  ;;  %v5245_v16 = vadd.f32 %v3955_v41, %v3468_v0  ;;  %1475 = vrot.lane.b32.xlu1 %v5236_v7, %s4724_s6  ;;  %v1379_v17 = vpop.f32.mrb[51].mxu1  ;;  %v1443_v41 = vld [vmem:[%s6268_s1 + $0x20] sm:$0xff] }
 0x233   :  { %3330 = vst.msk [vmem:[%s6278_s11] sm:$0xff] %vm3329_vm0, %v5238_v14  ;;  %v5254_v57 = vadd.f32 %v3468_v0, %v1379_v17  ;;  %1471 = vrot.lane.b32.xlu0 %v5238_v14, %s4724_s6 }
 0x234   :  { %3333 = vst.msk [vmem:[%s6278_s11 + $0x18] sm:$0xff] %vm3329_vm0, %v5245_v16 }
 0x235   :  { %3331 = vst.msk [vmem:[%s6278_s11 + $0x8] sm:$0xff] %vm3329_vm0, %v5254_v57 }
 0x236   :  { %1477 = vrot.lane.b32.xlu1 %v5245_v16, %s4724_s6 }
 0x237   :  { %1473 = vrot.lane.b32.xlu0 %v5254_v57, %s4724_s6 }
 0x23f   :  { %v3958_v18 = vpop.f32.mrb[52].mxu1 }
 0x240   :  { %v5272_v19 = vadd.f32 %v3958_v18, %v3468_v0  ;;  %v1392_v20 = vpop.f32.mrb[53].mxu1 }
 0x241   :  { %v5274_v21 = vadd.f32 %v3468_v0, %v1392_v20  ;;  %v3959_v23 = vpop.f32.mrb[54].mxu1  ;;  %v1445_v20 = vld [vmem:[%s6268_s1 + $0x30] sm:$0xff] }
 0x242   :  { %3336 = vst.msk [vmem:[%s6278_s11 + $0x30] sm:$0xff] %vm3329_vm0, %v5272_v19  ;;  %v5281_v24 = vadd.f32 %v3959_v23, %v3468_v0  ;;  %v1395_v26 = vpop.f32.mrb[55].mxu1  ;;  %v4191_v23 = vld [vmem:[#allocation2 + $0xb4] ss:$28 sps:$4 sm:$0xff]  }
 0x243   :  { %3334 = vst.msk [vmem:[%s6278_s11 + $0x20] sm:$0xff] %vm3329_vm0, %v5274_v21  ;;  %v5288_v28 = vadd.f32 %v3468_v0, %v1395_v26  ;;  %1479 = vrot.lane.b32.xlu0 %v5274_v21, %s4724_s6 }
 0x244   :  { %3337 = vst.msk [vmem:[%s6278_s11 + $0x38] sm:$0xff] %vm3329_vm0, %v5281_v24 }
 0x245   :  { %3335 = vst.msk [vmem:[%s6278_s11 + $0x28] sm:$0xff] %vm3329_vm0, %v5288_v28  ;;  %1481 = vrot.lane.b32.xlu1 %v5288_v28, %s4724_s6 }
 0x247   :  { %1483 = vrot.lane.b32.xlu0 %v5272_v19, %s4724_s6 }
 0x249   :  { %1485 = vrot.lane.b32.xlu1 %v5281_v24, %s4724_s6 }
 0x24f   :  { %v3962_v54 = vpop.f32.mrb[56].mxu1 }
 0x250   :  { %v5308_v29 = vadd.f32 %v3962_v54, %v3468_v0  ;;  %v1408_v31 = vpop.f32.mrb[57].mxu1 }
 0x251   :  { %v5310_v32 = vadd.f32 %v3468_v0, %v1408_v31  ;;  %v3963_v58 = vpop.f32.mrb[58].mxu1  ;;  %v1446_v31 = vld [vmem:[%s6268_s1 + $0x38] sm:$0xff] }
 0x252   :  { %3340 = vst.msk [vmem:[%s6278_s11 + $0x50] sm:$0xff] %vm3329_vm0, %v5308_v29  ;;  %v5317_v33 = vadd.f32 %v3963_v58, %v3468_v0  ;;  %v1411_v34 = vpop.f32.mrb[59].mxu1 }
 0x253   :  { %3338 = vst.msk [vmem:[%s6278_s11 + $0x40] sm:$0xff] %vm3329_vm0, %v5310_v32  ;;  %v5324_v6 = vadd.f32 %v3468_v0, %v1411_v34  ;;  %1487 = vrot.lane.b32.xlu0 %v5310_v32, %s4724_s6 }
 0x254   :  { %3341 = vst.msk [vmem:[%s6278_s11 + $0x58] sm:$0xff] %vm3329_vm0, %v5317_v33 }
 0x255   :  { %3339 = vst.msk [vmem:[%s6278_s11 + $0x48] sm:$0xff] %vm3329_vm0, %v5324_v6  ;;  %1489 = vrot.lane.b32.xlu1 %v5324_v6, %s4724_s6 }
 0x257   :  { %1491 = vrot.lane.b32.xlu0 %v5308_v29, %s4724_s6 }
 0x259   :  { %1493 = vrot.lane.b32.xlu1 %v5317_v33, %s4724_s6 }
 0x25f   :  { %v3966_v35 = vpop.f32.mrb[60].mxu1 }
 0x260   :  { %v5344_v36 = vadd.f32 %v3966_v35, %v3468_v0  ;;  %v1424_v37 = vpop.f32.mrb[61].mxu1 }
 0x261   :  { %v5346_v9 = vadd.f32 %v3468_v0, %v1424_v37  ;;  %v3967_v39 = vpop.f32.mrb[62].mxu1  ;;  %v4189_v37 = vld [vmem:[#allocation2 + $0xb0] ss:$28 sps:$4 sm:$0xff]  }
 0x262   :  { %3344 = vst.msk [vmem:[%s6278_s11 + $0x70] sm:$0xff] %vm3329_vm0, %v5344_v36  ;;  %v5353_v40 = vadd.f32 %v3967_v39, %v3468_v0  ;;  %v1427_v42 = vpop.f32.mrb[63].mxu1 }
 0x263   :  { %3342 = vst.msk [vmem:[%s6278_s11 + $0x60] sm:$0xff] %vm3329_vm0, %v5346_v9  ;;  %v5360_v44 = vadd.f32 %v3468_v0, %v1427_v42  ;;  %1495 = vrot.lane.b32.xlu0 %v5346_v9, %s4724_s6  ;;  %v4197_v42 = vld [vmem:[#allocation2 + $0xec] ss:$28 sps:$4 sm:$0xff]  }
 0x264   :  { %3345 = vst.msk [vmem:[%s6278_s11 + $0x78] sm:$0xff] %vm3329_vm0, %v5353_v40 }
 0x265   :  { %3343 = vst.msk [vmem:[%s6278_s11 + $0x68] sm:$0xff] %vm3329_vm0, %v5360_v44  ;;  %1497 = vrot.lane.b32.xlu1 %v5360_v44, %s4724_s6 }
 0x267   :  { %1499 = vrot.lane.b32.xlu0 %v5344_v36, %s4724_s6 }
 0x269   :  { %1501 = vrot.lane.b32.xlu1 %v5353_v40, %s4724_s6 }
 0x2a4   :  { %v1476_v50 = vpop.permute.xlu1 %1475 }
 0x2a5   :  { %v1472_v30 = vpop.permute.xlu0 %1471  ;;  %v1521_v1 = vmul.f32 %v1476_v50, %v1441_v60 }
 0x2a6   :  { %v1519_v62 = vmul.f32 %v1472_v30, %v1439_v59 }
 0x2a7   :  { %v1537_v48 = vadd.f32 %v1521_v1, %v5236_v7  ;;  %v1444_v7 = vld [vmem:[%s6268_s1 + $0x28] sm:$0xff] }
 0x2a8   :  { %v1478_v63 = vpop.permute.xlu1 %1477  ;;  %v1535_v10 = vadd.f32 %v1519_v62, %v5238_v14  ;;  %v4185_v14 = vld [vmem:[#allocation2 + $0x7c] ss:$28 sps:$4 sm:$0xff]  }
 0x2a9   :  { %v1522_v2 = vmul.f32 %v1478_v63, %v1442_v55  ;;  %v1474_v4 = vpop.permute.xlu0 %1473 }
 0x2aa   :  { %v1520_v5 = vmul.f32 %v1474_v4, %v1440_v61 }
 0x2ab   :  { %v1538_v45 = vadd.f32 %v1522_v2, %v5245_v16  ;;  %v1451_v2 = vld [vmem:[%s6268_s1 + $0x60] sm:$0xff] }
 0x2ac   :  { %v1536_v38 = vadd.f32 %v1520_v5, %v5254_v57  ;;  %v4183_v57 = vld [vmem:[#allocation2 + $0x78] ss:$28 sps:$4 sm:$0xff]  }
 0x2ad   :  { %v1552_v0 = vpack.c.bf16 %v1538_v45, %v1537_v48 }
 0x2ae   :  { %v1551_v11 = vpack.c.bf16 %v1536_v38, %v1535_v10  ;;  %v1454_v10 = vld [vmem:[%s6268_s1 + $0x78] sm:$0xff] }
 0x2b0   :  { %3970 = vmatprep.mubr.msk.bf16.mxu0 %vm1574_vm1, %v1551_v11 }
 0x2b1   :  { %3971 = vmatmul.mubr.msk.bf16.vlgmr.msra.gmra.mrb[64].mxu0 %vm1574_vm1, %v1552_v0 }
 0x2b2   :  { %2223 = vmatpush1.bf16.msra.mxu0 %v4171_v13 }
 0x2b3   :  { %2224 = vmatprep.subr.bf16.mxu0 %v4179_v15 }
 0x2b5   :  { %v1480_v16 = vpop.permute.xlu0 %1479 }
 0x2b6   :  { %v1523_v17 = vmul.f32 %v1480_v16, %v1443_v41  ;;  %2225 = vmatpush1.bf16.msra.mxu0 %v4177_v3  ;;  %v4206_v16 = vld [vmem:[#allocation2 + $0x154] ss:$28 sps:$4 sm:$0xff]  }
 0x2b7   :  { %v1482_v18 = vpop.permute.xlu1 %1481  ;;  %2226 = vmatprep.subr.bf16.mxu0 %v4185_v14  ;;  %2121 = vmatprep.subr.bf16.mxu1 %v4206_v16 }
 0x2b8   :  { %v1524_v26 = vmul.f32 %v1482_v18, %v1444_v7  ;;  %v1539_v58 = vadd.f32 %v1523_v17, %v5274_v21  ;;  %v4209_v7 = vld [vmem:[#allocation2 + $0x15c] ss:$28 sps:$4 sm:$0xff]   ;;  %v4204_v17 = vld [vmem:[#allocation2 + $0x150] ss:$28 sps:$4 sm:$0xff]   ;;  %v4210_v18 = vld [vmem:[#allocation2 + $0x188] ss:$28 sps:$4 sm:$0xff]  }
 0x2b9   :  { %v1484_v54 = vpop.permute.xlu0 %1483  ;;  %2122 = vmatpush1.bf16.msra.mxu1 %v4204_v17 }
 0x2ba   :  { %v1540_v34 = vadd.f32 %v1524_v26, %v5288_v28  ;;  %v1525_v35 = vmul.f32 %v1484_v54, %v1445_v20  ;;  %2227 = vmatpush1.bf16.msra.mxu0 %v4183_v57  ;;  %v1447_v28 = vld [vmem:[%s6268_s1 + $0x40] sm:$0xff]  ;;  %v4207_v57 = vld [vmem:[#allocation2 + $0x158] ss:$28 sps:$4 sm:$0xff]   ;;  %v4213_v20 = vld [vmem:[#allocation2 + $0x190] ss:$28 sps:$4 sm:$0xff]  }
 0x2bb   :  { %v1486_v39 = vpop.permute.xlu1 %1485  ;;  %2228 = vmatprep.subr.bf16.mxu0 %v4191_v23  ;;  %v4231_v23 = vld [vmem:[#allocation2 + $0x18] ss:$28 sps:$4 sm:$0xff]   ;;  %v5457_v26 = vld [vmem:[%s6274_s7] ss:$0 sm:$0xff] }
 0x2bc   :  { %v1553_v8 = vpack.c.bf16 %v1540_v34, %v1539_v58  ;;  %v1526_v43 = vmul.f32 %v1486_v39, %v1446_v31  ;;  %v1541_v46 = vadd.f32 %v1525_v35, %v5272_v19  ;;  %v1448_v19 = vld [vmem:[%s6268_s1 + $0x48] sm:$0xff] }
 0x2be   :  { %v1542_v12 = vadd.f32 %v1526_v43, %v5281_v24  ;;  %3974 = vmatprep.mubr.msk.bf16.mxu0 %vm1574_vm1, %v1553_v8  ;;  %2229 = vmatpush1.bf16.msra.mxu0 %v4189_v37 }
 0x2bf   :  { %2230 = vmatprep.subr.bf16.mxu0 %v4197_v42 }
 0x2c0   :  { %v1554_v21 = vpack.c.bf16 %v1542_v12, %v1541_v46 }
 0x2c2   :  { %3975 = vmatmul.mubr.msk.bf16.gmra.mrb[68].mxu0 %vm1574_vm1, %v1554_v21  ;;  %v4216_v21 = vld [vmem:[#allocation2 + $0x10] ss:$28 sps:$4 sm:$0xff]  }
 0x2c3   :  { %2231 = vmatpush1.bf16.msra.mxu0 %v4195_v47 }
 0x2c4   :  { %2232 = vmatprep.subr.bf16.mxu0 %v4203_v49 }
 0x2c5   :  { %v1488_v52 = vpop.permute.xlu0 %1487 }
 0x2c6   :  { %v1527_v24 = vmul.f32 %v1488_v52, %v1447_v28  ;;  %v4221_v28 = vld [vmem:[#allocation2 + $0x4c] ss:$28 sps:$4 sm:$0xff]  }
 0x2c7   :  { %v1490_v22 = vpop.permute.xlu1 %1489  ;;  %2233 = vmatpush1.bf16.msra.mxu0 %v4201_v51  ;;  %v4232_v51 = vld [vmem:[#allocation2 + $0x50] ss:$28 sps:$4 sm:$0xff]   ;;  %v4219_v52 = vld [vmem:[#allocation2 + $0x48] ss:$28 sps:$4 sm:$0xff]  }
 0x2c8   :  { %v1528_v56 = vmul.f32 %v1490_v22, %v1448_v19  ;;  %v1543_v50 = vadd.f32 %v1527_v24, %v5310_v32  ;;  %2234 = vmatprep.subr.bf16.mxu0 %v4209_v7  ;;  %v4224_v19 = vld [vmem:[#allocation2 + $0x84] ss:$28 sps:$4 sm:$0xff]  }
 0x2c9   :  { %v1492_v25 = vpop.permute.xlu0 %1491  ;;  %v4222_v24 = vld [vmem:[#allocation2 + $0x80] ss:$28 sps:$4 sm:$0xff]   ;;  %v4236_v22 = vld [vmem:[#allocation2 + $0x88] ss:$28 sps:$4 sm:$0xff]  }
 0x2ca   :  { %v1544_v59 = vadd.f32 %v1528_v56, %v5324_v6  ;;  %v1529_v30 = vmul.f32 %v1492_v25, %v1449_v53  ;;  %v1452_v6 = vld [vmem:[%s6268_s1 + $0x68] sm:$0xff]  ;;  %v4227_v56 = vld [vmem:[#allocation2 + $0xbc] ss:$28 sps:$4 sm:$0xff]  }
 0x2cb   :  { %v1494_v60 = vpop.permute.xlu1 %1493  ;;  %2235 = vmatpush1.bf16.msra.mxu0 %v4207_v57 }
 0x2cc   :  { %v1555_v55 = vpack.c.bf16 %v1544_v59, %v1543_v50  ;;  %v1530_v61 = vmul.f32 %v1494_v60, %v1450_v27  ;;  %v1545_v62 = vadd.f32 %v1529_v30, %v5308_v29  ;;  %v1453_v29 = vld [vmem:[%s6268_s1 + $0x70] sm:$0xff]  ;;  %v4237_v50 = vld [vmem:[#allocation2 + $0xc0] ss:$28 sps:$4 sm:$0xff]  }
 0x2ce   :  { %v1546_v63 = vadd.f32 %v1530_v61, %v5317_v33  ;;  %3978 = vmatprep.mubr.msk.bf16.mxu0 %vm1574_vm1, %v1555_v55  ;;  %v4225_v61 = vld [vmem:[#allocation2 + $0xb8] ss:$28 sps:$4 sm:$0xff]  }
 0x2d0   :  { %v1556_v1 = vpack.c.bf16 %v1546_v63, %v1545_v62  ;;  %v4230_v63 = vld [vmem:[#allocation2 + $0xf4] ss:$28 sps:$4 sm:$0xff]  }
 0x2d2   :  { %3979 = vmatmul.mubr.msk.bf16.gmra.mrb[72].mxu0 %vm1574_vm1, %v1556_v1 }
 0x2d5   :  { %v1496_v32 = vpop.permute.xlu0 %1495 }
 0x2d6   :  { %v1531_v4 = vmul.f32 %v1496_v32, %v1451_v2  ;;  %v4241_v32 = vld [vmem:[#allocation2 + $0xf8] ss:$28 sps:$4 sm:$0xff]  }
 0x2d7   :  { %v1498_v5 = vpop.permute.xlu1 %1497 }
 0x2d8   :  { %v1532_v33 = vmul.f32 %v1498_v5, %v1452_v6  ;;  %v1547_v38 = vadd.f32 %v1531_v4, %v5346_v9  ;;  %v4212_v9 = vld [vmem:[#allocation2 + $0x18c] ss:$28 sps:$4 sm:$0xff]  }
 0x2d9   :  { %v1500_v45 = vpop.permute.xlu0 %1499  ;;  %2123 = vmatprep.subr.bf16.mxu1 %v4212_v9 }
 0x2da   :  { %v1548_v48 = vadd.f32 %v1532_v33, %v5360_v44  ;;  %v1533_v11 = vmul.f32 %v1500_v45, %v1453_v29  ;;  %v4215_v44 = vld [vmem:[#allocation2 + $0x194] ss:$28 sps:$4 sm:$0xff]   ;;  %2124 = vmatpush1.bf16.msra.mxu1 %v4210_v18  ;;  %v4235_v45 = vld [vmem:[#allocation2 + $0x12c] ss:$28 sps:$4 sm:$0xff]  }
 0x2db   :  { %v1502_v13 = vpop.permute.xlu1 %1501  ;;  %2236 = vmatprep.subr.bf16.mxu0 %v4215_v44  ;;  %v4228_v33 = vld [vmem:[#allocation2 + $0xf0] ss:$28 sps:$4 sm:$0xff]   ;;  %v4243_v44 = vld [vmem:[#allocation2 + $0x198] ss:$28 sps:$4 sm:$0xff]  }
 0x2dc   :  { %v1557_v0 = vpack.c.bf16 %v1548_v48, %v1547_v38  ;;  %v1534_v15 = vmul.f32 %v1502_v13, %v1454_v10  ;;  %v1549_v3 = vadd.f32 %v1533_v11, %v5344_v36  ;;  %2237 = vmatpush1.bf16.msra.mxu0 %v4213_v20  ;;  %v4725_v36 = vmov 0   ;;  %v4242_v10 = vld [vmem:[#allocation2 + $0x130] ss:$28 sps:$4 sm:$0xff]   ;;  %v4233_v38 = vld [vmem:[#allocation2 + $0x128] ss:$28 sps:$4 sm:$0xff]  }
 0x2dd   :  { %2141 = vmatprep.mubr.bf16.mxu1 %v4725_v36  ;;  %3986 = vmatprep.subr.bf16.mxu0 %v4231_v23  ;;  %v4240_v48 = vld [vmem:[#allocation2 + $0x164] ss:$28 sps:$4 sm:$0xff]  }
 0x2de   :  { %v1550_v41 = vadd.f32 %v1534_v15, %v5353_v40  ;;  %3982 = vmatprep.mubr.msk.bf16.mxu0 %vm1574_vm1, %v1557_v0  ;;  %v4218_v40 = vld [vmem:[#allocation2 + $0x14] ss:$28 sps:$4 sm:$0xff]   ;;  %v4246_v11 = vld [vmem:[#allocation2 + $0x168] ss:$28 sps:$4 sm:$0xff]   ;;  %v4238_v0 = vld [vmem:[#allocation2 + $0x160] ss:$28 sps:$4 sm:$0xff]  }
 0x2df   :  { %2335 = vmatprep.subr.bf16.mxu1 %v4218_v40 }
 0x2e0   :  { %v1558_v14 = vpack.c.bf16 %v1550_v41, %v1549_v3  ;;  %v4245_v41 = vld [vmem:[#allocation2 + $0x19c] ss:$28 sps:$4 sm:$0xff]  }
 0x2e2   :  { %3983 = vmatmul.mubr.msk.bf16.gmra.mrb[76].mxu0 %vm1574_vm1, %v1558_v14  ;;  %v4247_v14 = vld [vmem:[#allocation2 + $0x1a0] ss:$28 sps:$4 sm:$0xff]  }
 0x2e3   :  { %2254 = vmatprep.mubr.bf16.mxu0 %v4725_v36 }
 0x384   :  { %v3972_v54 = vpop.f32.mrb[64].mxu0 }
 0x385   :  { %v1642_v31 = vadd.f32 %v3972_v54, %v5457_v26  ;;  %v1633_v58 = vpop.f32.mrb[65].mxu0 }
 0x386   :  { %v1634_v34 = vadd.f32 %v5457_v26, %v1633_v58  ;;  %v3973_v35 = vpop.f32.mrb[66].mxu0 }
 0x387   :  { %v1645_v37 = vadd.f32 %v3973_v35, %v5457_v26  ;;  %v1636_v39 = vpop.f32.mrb[67].mxu0  ;;  %v1698_v8 = vmax.f32 %v1642_v31, 0.0 }
 0x388   :  { %v1637_v42 = vadd.f32 %v5457_v26, %v1636_v39  ;;  %v1696_v46 = vmax.f32 %v1634_v34, 0.0 }
 0x389   :  { %v1699_v43 = vmax.f32 %v1645_v37, 0.0 }
 0x38a   :  { %v1697_v12 = vmax.f32 %v1637_v42, 0.0 }
 0x38b   :  { %v5463_v47 = vpack.c.bf16 %v1699_v43, %v1698_v8 }
 0x38c   :  { %v5465_v49 = vpack.c.bf16 %v1697_v12, %v1696_v46 }
 0x38e   :  { %2142 = vmatmul.mubr.bf16.vlgmr.msra.gmra.mrb[64].mxu1 %v5465_v49  ;;  %2255 = vmatmul.mubr.bf16.vlgmr.msra.gmra.mrb[80].mxu0 %v5465_v49 }
 0x38f   :  { %2336 = vmatpush1.bf16.msra.mxu1 %v4216_v21  ;;  %2151 = vmatprep.mubr.bf16.mxu1 %v4725_v36 }
 0x390   :  { %2264 = vmatprep.mubr.bf16.mxu0 %v4725_v36  ;;  %2337 = vmatprep.subr.bf16.mxu1 %v4221_v28 }
 0x391   :  { %3987 = vmatpush3.bf16.msra.mxu0 %v4231_v23 }
 0x392   :  { %3988 = vmatprep.subr.bf16.mxu0 %v4232_v51 }
 0x393   :  { %2338 = vmatpush1.bf16.msra.mxu1 %v4219_v52 }
 0x394   :  { %2339 = vmatprep.subr.bf16.mxu1 %v4224_v19 }
 0x395   :  { %v3976_v53 = vpop.f32.mrb[68].mxu0  ;;  %3989 = vmatpush3.bf16.msra.mxu0 %v4232_v51 }
 0x396   :  { %v1658_v25 = vadd.f32 %v3976_v53, %v5457_v26  ;;  %v1649_v27 = vpop.f32.mrb[69].mxu0  ;;  %2152 = vmatmul.mubr.bf16.gmra.mrb[68].mxu1 %v5463_v47  ;;  %2265 = vmatmul.mubr.bf16.gmra.mrb[84].mxu0 %v5463_v47 }
 0x397   :  { %v1650_v59 = vadd.f32 %v5457_v26, %v1649_v27  ;;  %v3977_v30 = vpop.f32.mrb[70].mxu0  ;;  %2161 = vmatprep.mubr.bf16.mxu1 %v4725_v36  ;;  %2274 = vmatprep.mubr.bf16.mxu0 %v4725_v36 }
 0x398   :  { %v1661_v60 = vadd.f32 %v3977_v30, %v5457_v26  ;;  %v1652_v55 = vpop.f32.mrb[71].mxu0  ;;  %2340 = vmatpush1.bf16.msra.mxu1 %v4222_v24  ;;  %3990 = vmatprep.subr.bf16.mxu0 %v4236_v22  ;;  %v1702_v1 = vmax.f32 %v1658_v25, 0.0  ;;  %v5528_v24 = vld [vmem:[%s6276_s9] sm:$0xff] }
 0x399   :  { %v1653_v62 = vadd.f32 %v5457_v26, %v1652_v55  ;;  %2341 = vmatprep.subr.bf16.mxu1 %v4227_v56  ;;  %3991 = vmatpush3.bf16.msra.mxu0 %v4236_v22  ;;  %v1700_v6 = vmax.f32 %v1650_v59, 0.0 }
 0x39a   :  { %v1703_v2 = vmax.f32 %v1661_v60, 0.0  ;;  %3992 = vmatprep.subr.bf16.mxu0 %v4237_v50 }
 0x39b   :  { %v1701_v4 = vmax.f32 %v1653_v62, 0.0 }
 0x39c   :  { %v5479_v5 = vpack.c.bf16 %v1703_v2, %v1702_v1  ;;  %2342 = vmatpush1.bf16.msra.mxu1 %v4225_v61 }
 0x39d   :  { %v5481_v29 = vpack.c.bf16 %v1701_v4, %v1700_v6  ;;  %2343 = vmatprep.subr.bf16.mxu1 %v4230_v63  ;;  %3993 = vmatpush3.bf16.msra.mxu0 %v4237_v50 }
 0x39e   :  { %3994 = vmatprep.subr.bf16.mxu0 %v4241_v32 }
 0x39f   :  { %2162 = vmatmul.mubr.bf16.gmra.mrb[72].mxu1 %v5481_v29  ;;  %2275 = vmatmul.mubr.bf16.gmra.mrb[88].mxu0 %v5481_v29 }
 0x3a0   :  { %2171 = vmatprep.mubr.bf16.mxu1 %v4725_v36  ;;  %2284 = vmatprep.mubr.bf16.mxu0 %v4725_v36 }
 0x3a1   :  { %2344 = vmatpush1.bf16.msra.mxu1 %v4228_v33  ;;  %3995 = vmatpush3.bf16.msra.mxu0 %v4241_v32 }
 0x3a2   :  { %2345 = vmatprep.subr.bf16.mxu1 %v4235_v45  ;;  %3996 = vmatprep.subr.bf16.mxu0 %v4242_v10 }
 0x3a5   :  { %v3980_v13 = vpop.f32.mrb[72].mxu0  ;;  %2346 = vmatpush1.bf16.msra.mxu1 %v4233_v38  ;;  %3997 = vmatpush3.bf16.msra.mxu0 %v4242_v10 }
 0x3a6   :  { %v1674_v15 = vadd.f32 %v3980_v13, %v5457_v26  ;;  %v1665_v3 = vpop.f32.mrb[73].mxu0  ;;  %2347 = vmatprep.subr.bf16.mxu1 %v4240_v48  ;;  %3998 = vmatprep.subr.bf16.mxu0 %v4246_v11 }
 0x3a7   :  { %v1666_v16 = vadd.f32 %v5457_v26, %v1665_v3  ;;  %v3981_v7 = vpop.f32.mrb[74].mxu0  ;;  %2172 = vmatmul.mubr.bf16.gmra.mrb[76].mxu1 %v5479_v5  ;;  %2285 = vmatmul.mubr.bf16.gmra.mrb[92].mxu0 %v5479_v5 }
 0x3a8   :  { %v1677_v17 = vadd.f32 %v3981_v7, %v5457_v26  ;;  %v1668_v57 = vpop.f32.mrb[75].mxu0  ;;  %2181 = vmatprep.mubr.bf16.mxu1 %v4725_v36  ;;  %2294 = vmatprep.mubr.bf16.mxu0 %v4725_v36  ;;  %v1706_v18 = vmax.f32 %v1674_v15, 0.0 }
 0x3a9   :  { %v1669_v9 = vadd.f32 %v5457_v26, %v1668_v57  ;;  %2348 = vmatpush1.bf16.msra.mxu1 %v4238_v0  ;;  %3999 = vmatpush3.bf16.msra.mxu0 %v4246_v11  ;;  %v1704_v40 = vmax.f32 %v1666_v16, 0.0 }
 0x3aa   :  { %v1707_v20 = vmax.f32 %v1677_v17, 0.0  ;;  %2349 = vmatprep.subr.bf16.mxu1 %v4245_v41  ;;  %4000 = vmatprep.subr.bf16.mxu0 %v4247_v14 }
 0x3ab   :  { %v1705_v23 = vmax.f32 %v1669_v9, 0.0 }
 0x3ac   :  { %v1717_v54 = vpack.c.bf16 %v1707_v20, %v1706_v18 }
 0x3ad   :  { %v1716_v31 = vpack.c.bf16 %v1705_v23, %v1704_v40  ;;  %2350 = vmatpush1.bf16.msra.mxu1 %v4243_v44  ;;  %4001 = vmatpush3.bf16.msra.mxu0 %v4247_v14 }
 0x3af   :  { %2182 = vmatmul.mubr.bf16.gmra.mrb[80].mxu1 %v1716_v31  ;;  %2295 = vmatmul.mubr.bf16.gmra.mrb[96].mxu0 %v1716_v31 }
 0x3b0   :  { %2191 = vmatprep.mubr.bf16.mxu1 %v4725_v36  ;;  %2304 = vmatprep.mubr.bf16.mxu0 %v4725_v36 }
 0x3b5   :  { %v3984_v58 = vpop.f32.mrb[76].mxu0 }
 0x3b6   :  { %v1690_v34 = vadd.f32 %v3984_v58, %v5457_v26  ;;  %v1681_v35 = vpop.f32.mrb[77].mxu0 }
 0x3b7   :  { %v1682_v37 = vadd.f32 %v5457_v26, %v1681_v35  ;;  %v3985_v39 = vpop.f32.mrb[78].mxu0  ;;  %2192 = vmatmul.mubr.bf16.gmra.mrb[84].mxu1 %v1717_v54  ;;  %2305 = vmatmul.mubr.bf16.gmra.mrb[100].mxu0 %v1717_v54 }
 0x3b8   :  { %v1693_v42 = vadd.f32 %v3985_v39, %v5457_v26  ;;  %v1684_v8 = vpop.f32.mrb[79].mxu0  ;;  %2201 = vmatprep.mubr.bf16.mxu1 %v4725_v36  ;;  %2314 = vmatprep.mubr.bf16.mxu0 %v4725_v36  ;;  %v1710_v46 = vmax.f32 %v1690_v34, 0.0 }
 0x3b9   :  { %v1685_v43 = vadd.f32 %v5457_v26, %v1684_v8  ;;  %v1708_v21 = vmax.f32 %v1682_v37, 0.0  ;;  %v1786_v26 = vlaneseq }
 0x3ba   :  { %v1711_v12 = vmax.f32 %v1693_v42, 0.0 }
 0x3bb   :  { %v1709_v28 = vmax.f32 %v1685_v43, 0.0 }
 0x3bc   :  { %v1719_v51 = vpack.c.bf16 %v1711_v12, %v1710_v46 }
 0x3bd   :  { %v1718_v52 = vpack.c.bf16 %v1709_v28, %v1708_v21 }
 0x3bf   :  { %2202 = vmatmul.mubr.bf16.gmra.mrb[88].mxu1 %v1718_v52  ;;  %2315 = vmatmul.mubr.bf16.gmra.mrb[104].mxu0 %v1718_v52 }
 0x3c0   :  { %2211 = vmatprep.mubr.bf16.mxu1 %v4725_v36  ;;  %2324 = vmatprep.mubr.bf16.mxu0 %v4725_v36 }
 0x3c7   :  { %2212 = vmatmul.mubr.bf16.gmra.mrb[92].mxu1 %v1719_v51  ;;  %2325 = vmatmul.mubr.bf16.gmra.mrb[108].mxu0 %v1719_v51 }
 0x3c8   :  { %4002 = vmatprep.mubr.bf16.mxu0 %v5465_v49  ;;  %2367 = vmatprep.mubr.bf16.mxu1 %v4725_v36 }
 0x3cf   :  { %2368 = vmatmul.mubr.bf16.vlgmr.msra.gmra.mrb[96].mxu1 %v5465_v49  ;;  %4003 = vmatmul.mubr.bf16.vlgmr.msra.gmra.mrb[112].mxu0 %v5463_v47 }
 0x3d0   :  { %4006 = vmatprep.mubr.bf16.mxu0 %v5481_v29  ;;  %2377 = vmatprep.mubr.bf16.mxu1 %v4725_v36 }
 0x3d7   :  { %2378 = vmatmul.mubr.bf16.gmra.mrb[100].mxu1 %v5463_v47  ;;  %4007 = vmatmul.mubr.bf16.gmra.mrb[116].mxu0 %v5479_v5  ;;  %v5521_v47 = vshrl.u32 %v1786_v26, 7 }
 0x3d8   :  { %4010 = vmatprep.mubr.bf16.mxu0 %v1716_v31  ;;  %2387 = vmatprep.mubr.bf16.mxu1 %v4725_v36 }
 0x3d9   :  { %v1788_v49 = vsub.s32 0, %v5521_v47  ;;  %v1796_v19 = vsub.s32 2, %v5521_v47  ;;  %v1792_v22 = vsub.s32 1, %v5521_v47  ;;  %v1800_v53 = vsub.s32 3, %v5521_v47 }
 0x3db   :  { %v5533_v56 = vrot.slane %v5528_v24, %v1788_v49  ;;  %v5539_v25 = vrot.slane %v5528_v24, %v1792_v22  ;;  %v5542_v27 = vrot.slane %v5528_v24, %v1800_v53 }
 0x3df   :  { %2388 = vmatmul.mubr.bf16.gmra.mrb[104].mxu1 %v5481_v29  ;;  %4011 = vmatmul.mubr.bf16.gmra.mrb[120].mxu0 %v1717_v54 }
 0x3e0   :  { %4014 = vmatprep.mubr.bf16.mxu0 %v1718_v52  ;;  %2397 = vmatprep.mubr.bf16.mxu1 %v4725_v36 }
 0x3e7   :  { %2398 = vmatmul.mubr.bf16.gmra.mrb[108].mxu1 %v5479_v5  ;;  %4015 = vmatmul.mubr.bf16.gmra.mrb[124].mxu0 %v1719_v51 }
 0x3e8   :  { %2407 = vmatprep.mubr.bf16.mxu1 %v4725_v36 }
 0x3ef   :  { %2408 = vmatmul.mubr.bf16.gmra.mrb[112].mxu1 %v1716_v31 }
 0x3f0   :  { %2417 = vmatprep.mubr.bf16.mxu1 %v4725_v36 }
 0x3f7   :  { %2418 = vmatmul.mubr.bf16.gmra.mrb[116].mxu1 %v1717_v54 }
 0x3f8   :  { %2427 = vmatprep.mubr.bf16.mxu1 %v4725_v36 }
 0x3ff   :  { %2428 = vmatmul.mubr.bf16.gmra.mrb[120].mxu1 %v1718_v52 }
 0x400   :  { %2437 = vmatprep.mubr.bf16.mxu1 %v4725_v36  ;;  %v5536_v36 = vrot.slane %v5528_v24, %v1796_v19 }
 0x407   :  { %2438 = vmatmul.mubr.bf16.gmra.mrb[124].mxu1 %v1719_v51 }
 0x461   :  { %v2143_v50 = vpop.f32.mrb[64].mxu1  ;;  %v2256_v59 = vpop.f32.mrb[80].mxu0 }
 0x462   :  { %v2144_v30 = vadd.f32 %v2143_v50, %v5533_v56  ;;  %v2257_v60 = vadd.f32 %v2256_v59, %v5536_v36  ;;  %v2145_v55 = vpop.f32.mrb[65].mxu1  ;;  %v2258_v61 = vpop.f32.mrb[81].mxu0 }
 0x463   :  { %v2146_v62 = vadd.f32 %v2145_v55, %v5539_v25  ;;  %v2259_v63 = vadd.f32 %v2258_v61, %v5542_v27  ;;  %v2147_v1 = vpop.f32.mrb[66].mxu1  ;;  %v2260_v2 = vpop.f32.mrb[82].mxu0 }
 0x464   :  { %v3543_v32 = vmul.f32 -1.442695, %v2144_v30  ;;  %v3545_v6 = vmul.f32 -1.442695, %v2257_v60  ;;  %v2148_v4 = vadd.f32 %v2147_v1, %v5533_v56  ;;  %v2261_v5 = vadd.f32 %v2260_v2, %v5536_v36  ;;  %v2149_v29 = vpop.f32.mrb[67].mxu1  ;;  %v2262_v33 = vpop.f32.mrb[83].mxu0 }
 0x465   :  { %v3544_v45 = vmul.f32 -1.442695, %v2146_v62  ;;  %v3546_v10 = vmul.f32 -1.442695, %v2259_v63  ;;  %v2150_v38 = vadd.f32 %v2149_v29, %v5539_v25  ;;  %v2263_v48 = vadd.f32 %v2262_v33, %v5542_v27 }
 0x466   :  { %4248 = vpow2.f32 %v3543_v32  ;;  %v3550_v11 = vmul.f32 -1.442695, %v2148_v4  ;;  %v3552_v13 = vmul.f32 -1.442695, %v2261_v5 }
 0x467   :  { %4250 = vpow2.f32 %v3545_v6  ;;  %v3551_v0 = vmul.f32 -1.442695, %v2150_v38  ;;  %v3553_v15 = vmul.f32 -1.442695, %v2263_v48 }
 0x468   :  { %4252 = vpow2.f32 %v3544_v45 }
 0x469   :  { %4254 = vpow2.f32 %v3546_v10  ;;  %v2153_v3 = vpop.f32.mrb[68].mxu1  ;;  %v2266_v41 = vpop.f32.mrb[84].mxu0 }
 0x46a   :  { %4256 = vpow2.f32 %v3550_v11  ;;  %v2154_v14 = vadd.f32 %v2153_v3, %v5533_v56  ;;  %v2267_v16 = vadd.f32 %v2266_v41, %v5536_v36  ;;  %v2155_v7 = vpop.f32.mrb[69].mxu1  ;;  %v2268_v17 = vpop.f32.mrb[85].mxu0 }
 0x46b   :  { %4258 = vpow2.f32 %v3552_v13  ;;  %v2156_v57 = vadd.f32 %v2155_v7, %v5539_v25  ;;  %v2269_v9 = vadd.f32 %v2268_v17, %v5542_v27  ;;  %v2157_v44 = vpop.f32.mrb[70].mxu1  ;;  %v2270_v18 = vpop.f32.mrb[86].mxu0 }
 0x46c   :  { %4260 = vpow2.f32 %v3551_v0  ;;  %v3557_v20 = vmul.f32 -1.442695, %v2154_v14  ;;  %v3559_v40 = vmul.f32 -1.442695, %v2267_v16  ;;  %v2158_v23 = vadd.f32 %v2157_v44, %v5533_v56  ;;  %v2159_v54 = vpop.f32.mrb[71].mxu1  ;;  %v2272_v31 = vpop.f32.mrb[87].mxu0 }
 0x46d   :  { %4262 = vpow2.f32 %v3553_v15  ;;  %v3558_v58 = vmul.f32 -1.442695, %v2156_v57  ;;  %v3560_v34 = vmul.f32 -1.442695, %v2269_v9  ;;  %v2271_v2 = vadd.f32 %v2270_v18, %v5536_v36 }
 0x46e   :  { %4264 = vpow2.f32 %v3557_v20  ;;  %v3564_v35 = vmul.f32 -1.442695, %v2158_v23  ;;  %v2160_v4 = vadd.f32 %v2159_v54, %v5539_v25  ;;  %v2273_v33 = vadd.f32 %v2272_v31, %v5542_v27 }
 0x46f   :  { %4266 = vpow2.f32 %v3559_v40  ;;  %v3566_v3 = vmul.f32 -1.442695, %v2271_v2 }
 0x470   :  { %v4249_v37 = vpop.eup %4248  ;;  %4268 = vpow2.f32 %v3558_v58  ;;  %v3565_v57 = vmul.f32 -1.442695, %v2160_v4  ;;  %v3567_v40 = vmul.f32 -1.442695, %v2273_v33 }
 0x471   :  { %v4251_v39 = vpop.eup %4250  ;;  %v2881_v42 = vadd.f32 1.0, %v4249_v37  ;;  %4270 = vpow2.f32 %v3560_v34 }
 0x472   :  { %v4253_v8 = vpop.eup %4252  ;;  %v2883_v43 = vadd.f32 1.0, %v4251_v39  ;;  %4272 = vpow2.f32 %v3564_v35  ;;  %v2163_v46 = vpop.f32.mrb[72].mxu1 }
 0x473   :  { %v2276_v12 = vpop.f32.mrb[88].mxu0  ;;  %v4255_v21 = vpop.eup %4254  ;;  %4274 = vrcp.f32 %v2881_v42  ;;  %v2882_v28 = vadd.f32 1.0, %v4253_v8  ;;  %v2164_v48 = vadd.f32 %v2163_v46, %v5533_v56 }
 0x474   :  { %v2165_v51 = vpop.f32.mrb[73].mxu1  ;;  %v2278_v52 = vpop.f32.mrb[89].mxu0  ;;  %4276 = vrcp.f32 %v2883_v43  ;;  %v2884_v49 = vadd.f32 1.0, %v4255_v21  ;;  %v2277_v41 = vadd.f32 %v2276_v12, %v5536_v36 }
 0x475   :  { %v4257_v26 = vpop.eup %4256  ;;  %v2167_v19 = vpop.f32.mrb[74].mxu1  ;;  %4278 = vrcp.f32 %v2882_v28  ;;  %v2166_v9 = vadd.f32 %v2165_v51, %v5539_v25  ;;  %v2279_v23 = vadd.f32 %v2278_v52, %v5542_v27  ;;  %v3571_v58 = vmul.f32 -1.442695, %v2164_v48 }
 0x476   :  { %v2280_v22 = vpop.f32.mrb[90].mxu0  ;;  %v4259_v53 = vpop.eup %4258  ;;  %v2888_v50 = vadd.f32 1.0, %v4257_v26  ;;  %4280 = vrcp.f32 %v2884_v49  ;;  %v2168_v34 = vadd.f32 %v2167_v19, %v5533_v56  ;;  %v3573_v37 = vmul.f32 -1.442695, %v2277_v41 }
 0x477   :  { %v2169_v59 = vpop.f32.mrb[75].mxu1  ;;  %v4261_v30 = vpop.eup %4260  ;;  %v2890_v60 = vadd.f32 1.0, %v4259_v53  ;;  %v2281_v39 = vadd.f32 %v2280_v22, %v5536_v36  ;;  %v3572_v8 = vmul.f32 -1.442695, %v2166_v9  ;;  %v3574_v12 = vmul.f32 -1.442695, %v2279_v23 }
 0x478   :  { %v2282_v55 = vpop.f32.mrb[91].mxu0  ;;  %v4263_v61 = vpop.eup %4262  ;;  %4282 = vrcp.f32 %v2888_v50  ;;  %v2889_v62 = vadd.f32 1.0, %v4261_v30  ;;  %v2170_v43 = vadd.f32 %v2169_v59, %v5539_v25  ;;  %v3578_v26 = vmul.f32 -1.442695, %v2168_v34 }
 0x479   :  { %v4265_v63 = vpop.eup %4264  ;;  %4284 = vrcp.f32 %v2890_v60  ;;  %v2891_v1 = vadd.f32 1.0, %v4263_v61  ;;  %v2283_v21 = vadd.f32 %v2282_v55, %v5542_v27  ;;  %v3580_v50 = vmul.f32 -1.442695, %v2281_v39 }
 0x47a   :  { %v4267_v32 = vpop.eup %4266  ;;  %4286 = vrcp.f32 %v2889_v62  ;;  %v2895_v6 = vadd.f32 1.0, %v4265_v63  ;;  %v2173_v45 = vpop.f32.mrb[76].mxu1  ;;  %v3579_v61 = vmul.f32 -1.442695, %v2170_v43 }
 0x47b   :  { %v4269_v5 = vpop.eup %4268  ;;  %4288 = vrcp.f32 %v2891_v1  ;;  %v2897_v29 = vadd.f32 1.0, %v4267_v32  ;;  %v2286_v11 = vpop.f32.mrb[92].mxu0  ;;  %v2174_v49 = vadd.f32 %v2173_v45, %v5533_v56  ;;  %v3581_v2 = vmul.f32 -1.442695, %v2283_v21 }
 0x47c   :  { %v4271_v10 = vpop.eup %4270  ;;  %4290 = vrcp.f32 %v2895_v6  ;;  %v2896_v38 = vadd.f32 1.0, %v4269_v5  ;;  %v5561_v13 = vpop.f32.mrb[77].mxu1  ;;  %v2287_v59 = vadd.f32 %v2286_v11, %v5536_v36 }
 0x47d   :  { %v4273_v0 = vpop.eup %4272  ;;  %4292 = vrcp.f32 %v2897_v29  ;;  %v2898_v15 = vadd.f32 1.0, %v4271_v10  ;;  %v5564_v14 = vpop.f32.mrb[93].mxu0  ;;  %v3585_v6 = vmul.f32 -1.442695, %v2174_v49 }
 0x47e   :  { %v5566_v16 = vpop.f32.mrb[78].mxu1  ;;  %v4275_v7 = vpop.eup %4274  ;;  %4294 = vrcp.f32 %v2896_v38  ;;  %v2902_v17 = vadd.f32 1.0, %v4273_v0  ;;  %v3587_v29 = vmul.f32 -1.442695, %v2287_v59  ;;  %v2289_v39 = vadd.f32 %v5564_v14, %v5542_v27 }
 0x47f   :  { %v5569_v44 = vpop.f32.mrb[94].mxu0  ;;  %v5571_v18 = vpop.f32.mrb[79].mxu1  ;;  %3217 = vst [vmem:[%s6277_s10] sm:$0xff] %v4275_v7  ;;  %4296 = vrcp.f32 %v2898_v15 }
 0x480   :  { %v4277_v20 = vpop.eup %4276  ;;  %v5577_v54 = vpop.f32.mrb[95].mxu0  ;;  %4298 = vrcp.f32 %v2902_v17 }
 0x481   :  { %v4279_v31 = vpop.eup %4278  ;;  %3219 = vst [vmem:[%s6277_s10 + $0x10] sm:$0xff] %v4277_v20  ;;  %4300 = vpow2.f32 %v3566_v3 }
 0x482   :  { %v4281_v35 = vpop.eup %4280  ;;  %3218 = vst [vmem:[%s6277_s10 + $0x8] sm:$0xff] %v4279_v31  ;;  %4302 = vpow2.f32 %v3565_v57  ;;  %v5595_v28 = vpop.f32.mrb[80].mxu1 }
 0x483   :  { %v4283_v42 = vpop.eup %4282  ;;  %3220 = vst [vmem:[%s6277_s10 + $0x18] sm:$0xff] %v4281_v35  ;;  %4304 = vpow2.f32 %v3567_v40  ;;  %v5597_v51 = vpop.f32.mrb[96].mxu0 }
 0x484   :  { %v4285_v46 = vpop.eup %4284  ;;  %3224 = vst [vmem:[%s6277_s10 + $0x38] sm:$0xff] %v4283_v42  ;;  %4306 = vpow2.f32 %v3571_v58  ;;  %v5603_v19 = vpop.f32.mrb[81].mxu1  ;;  %v2176_v58 = vadd.f32 %v5561_v13, %v5539_v25 }
 0x485   :  { %v4287_v52 = vpop.eup %4286  ;;  %3226 = vst [vmem:[%s6277_s10 + $0x48] sm:$0xff] %v4285_v46  ;;  %v5605_v22 = vpop.f32.mrb[97].mxu0  ;;  %4308 = vpow2.f32 %v3573_v37 }
 0x486   :  { %v4289_v53 = vpop.eup %4288  ;;  %3225 = vst [vmem:[%s6277_s10 + $0x40] sm:$0xff] %v4287_v52  ;;  %v5611_v30 = vpop.f32.mrb[82].mxu1  ;;  %4310 = vpow2.f32 %v3572_v8 }
 0x487   :  { %v5613_v60 = vpop.f32.mrb[98].mxu0  ;;  %v4291_v55 = vpop.eup %4290  ;;  %3227 = vst [vmem:[%s6277_s10 + $0x50] sm:$0xff] %v4289_v53  ;;  %4312 = vpow2.f32 %v3574_v12  ;;  %v3586_v53 = vmul.f32 -1.442695, %v2176_v58 }
 0x488   :  { %v5618_v62 = vpop.f32.mrb[83].mxu1  ;;  %v2302_v63 = vpop.f32.mrb[99].mxu0  ;;  %3231 = vst [vmem:[%s6277_s10 + $0x70] sm:$0xff] %v4291_v55  ;;  %4314 = vpow2.f32 %v3578_v26 }
 0x489   :  { %v4293_v1 = vpop.eup %4292  ;;  %v5627_v4 = vadd.f32 %v2302_v63, %v5542_v27  ;;  %4316 = vpow2.f32 %v3580_v50  ;;  %v2178_v50 = vadd.f32 %v5566_v16, %v5533_v56  ;;  %v2291_v63 = vadd.f32 %v5569_v44, %v5536_v36 }
 0x48a   :  { %v4295_v32 = vpop.eup %4294  ;;  %3233 = vst [vmem:[%s6277_s10 + $0x80] sm:$0xff] %v4293_v1  ;;  %4318 = vpow2.f32 %v3579_v61  ;;  %v2193_v10 = vpop.f32.mrb[84].mxu1  ;;  %v3588_v61 = vmul.f32 -1.442695, %v2289_v39 }
 0x48b   :  { %v4297_v5 = vpop.eup %4296  ;;  %3232 = vst [vmem:[%s6277_s10 + $0x78] sm:$0xff] %v4295_v32  ;;  %4320 = vpow2.f32 %v3581_v2  ;;  %v2306_v38 = vpop.f32.mrb[100].mxu0  ;;  %v5639_v0 = vadd.f32 %v2193_v10, %v5533_v56 }
 0x48c   :  { %v4299_v33 = vpop.eup %4298  ;;  %3234 = vst [vmem:[%s6277_s10 + $0x88] sm:$0xff] %v4297_v5  ;;  %4322 = vpow2.f32 %v3585_v6  ;;  %v5642_v15 = vadd.f32 %v2306_v38, %v5536_v36  ;;  %v2195_v3 = vpop.f32.mrb[85].mxu1  ;;  %v2180_v6 = vadd.f32 %v5571_v18, %v5539_v25  ;;  %v3592_v18 = vmul.f32 -1.442695, %v2178_v50 }
 0x48d   :  { %v4301_v45 = vpop.eup %4300  ;;  %3238 = vst [vmem:[%s6277_s10 + $0xa8] sm:$0xff] %v4299_v33  ;;  %v2308_v41 = vpop.f32.mrb[101].mxu0  ;;  %4324 = vpow2.f32 %v3587_v29  ;;  %v5645_v57 = vadd.f32 %v2195_v3, %v5539_v25 }
 0x48e   :  { %v4303_v48 = vpop.eup %4302  ;;  %v2904_v11 = vadd.f32 1.0, %v4301_v45  ;;  %v5648_v9 = vadd.f32 %v2308_v41, %v5542_v27  ;;  %v2197_v20 = vpop.f32.mrb[86].mxu1 }
 0x48f   :  { %v4305_v7 = vpop.eup %4304  ;;  %v2903_v17 = vadd.f32 1.0, %v4303_v48  ;;  %v2310_v40 = vpop.f32.mrb[102].mxu0  ;;  %v5655_v46 = vadd.f32 %v2197_v20, %v5533_v56 }
 0x490   :  { %v4307_v23 = vpop.eup %4306  ;;  %4326 = vrcp.f32 %v2904_v11  ;;  %v2905_v31 = vadd.f32 1.0, %v4305_v7  ;;  %v2199_v34 = vpop.f32.mrb[87].mxu1  ;;  %v5658_v12 = vadd.f32 %v2310_v40, %v5536_v36 }
 0x491   :  { %v4309_v35 = vpop.eup %4308  ;;  %4328 = vrcp.f32 %v2903_v17  ;;  %v2909_v37 = vadd.f32 1.0, %v4307_v23  ;;  %v2312_v42 = vpop.f32.mrb[103].mxu0  ;;  %v5661_v52 = vadd.f32 %v2199_v34, %v5539_v25  ;;  %v2293_v23 = vadd.f32 %v5577_v54, %v5542_v27 }
 0x492   :  { %v4311_v8 = vpop.eup %4310  ;;  %4330 = vrcp.f32 %v2905_v31  ;;  %v2911_v43 = vadd.f32 1.0, %v4309_v35  ;;  %v5664_v26 = vadd.f32 %v2312_v42, %v5542_v27  ;;  %v2203_v1 = vpop.f32.mrb[88].mxu1  ;;  %v2184_v31 = vadd.f32 %v5595_v28, %v5533_v56 }
 0x493   :  { %v4313_v21 = vpop.eup %4312  ;;  %4332 = vrcp.f32 %v2909_v37  ;;  %v2910_v13 = vadd.f32 1.0, %v4311_v8  ;;  %v5673_v5 = vadd.f32 %v2203_v1, %v5533_v56  ;;  %v2316_v29 = vpop.f32.mrb[104].mxu0  ;;  %v2297_v37 = vadd.f32 %v5597_v51, %v5536_v36 }
 0x494   :  { %v4315_v14 = vpop.eup %4314  ;;  %4334 = vrcp.f32 %v2911_v43  ;;  %v2912_v49 = vadd.f32 1.0, %v4313_v21  ;;  %v2205_v33 = vpop.f32.mrb[89].mxu1  ;;  %v5676_v10 = vadd.f32 %v2316_v29, %v5536_v36  ;;  %v3594_v51 = vmul.f32 -1.442695, %v2291_v63 }
 0x495   :  { %v4317_v59 = vpop.eup %4316  ;;  %4336 = vrcp.f32 %v2910_v13  ;;  %v2916_v55 = vadd.f32 1.0, %v4315_v14  ;;  %v5679_v44 = vadd.f32 %v2205_v33, %v5539_v25  ;;  %v2318_v38 = vpop.f32.mrb[105].mxu0  ;;  %v3593_v13 = vmul.f32 -1.442695, %v2180_v6 }
 0x496   :  { %v4319_v2 = vpop.eup %4318  ;;  %4338 = vrcp.f32 %v2912_v49  ;;  %v2918_v32 = vadd.f32 1.0, %v4317_v59  ;;  %v2207_v48 = vpop.f32.mrb[90].mxu1  ;;  %v5682_v41 = vadd.f32 %v2318_v38, %v5542_v27  ;;  %v3595_v14 = vmul.f32 -1.442695, %v2293_v23 }
 0x497   :  { %v4321_v16 = vpop.eup %4320  ;;  %4340 = vrcp.f32 %v2916_v55  ;;  %v2917_v45 = vadd.f32 1.0, %v4319_v2  ;;  %v2320_v7 = vpop.f32.mrb[106].mxu0  ;;  %v5691_v39 = vadd.f32 %v2207_v48, %v5533_v56  ;;  %v2186_v49 = vadd.f32 %v5603_v19, %v5539_v25 }
 0x498   :  { %v4323_v11 = vpop.eup %4322  ;;  %4342 = vrcp.f32 %v2918_v32  ;;  %v2919_v3 = vadd.f32 1.0, %v4321_v16  ;;  %v2209_v17 = vpop.f32.mrb[91].mxu1  ;;  %v5697_v54 = vadd.f32 %v2320_v7, %v5536_v36  ;;  %v3599_v59 = vmul.f32 -1.442695, %v2184_v31 }
 0x499   :  { %v4325_v20 = vpop.eup %4324  ;;  %4344 = vrcp.f32 %v2917_v45  ;;  %v2923_v40 = vadd.f32 1.0, %v4323_v11  ;;  %v2322_v58 = vpop.f32.mrb[107].mxu0  ;;  %v5700_v28 = vadd.f32 %v2209_v17, %v5539_v25  ;;  %v3601_v55 = vmul.f32 -1.442695, %v2297_v37 }
 0x49a   :  { %v4327_v34 = vpop.eup %4326  ;;  %4346 = vrcp.f32 %v2919_v3  ;;  %v2925_v35 = vadd.f32 1.0, %v4325_v20  ;;  %v5703_v8 = vadd.f32 %v2322_v58, %v5542_v27  ;;  %v2299_v63 = vadd.f32 %v5605_v22, %v5542_v27  ;;  %v2213_v1 = vpop.f32.mrb[92].mxu1 }
 0x49b   :  { %v4329_v42 = vpop.eup %4328  ;;  %3240 = vst [vmem:[%s6277_s10 + $0xb8] sm:$0xff] %v4327_v34  ;;  %4348 = vrcp.f32 %v2923_v40  ;;  %v2326_v2 = vpop.f32.mrb[108].mxu0  ;;  %v2188_v19 = vadd.f32 %v5611_v30, %v5533_v56  ;;  %v2301_v33 = vadd.f32 %v5613_v60, %v5536_v36  ;;  %v3600_v11 = vmul.f32 -1.442695, %v2186_v49 }
 0x49c   :  { %v4331_v43 = vpop.eup %4330  ;;  %3239 = vst [vmem:[%s6277_s10 + $0xb0] sm:$0xff] %v4329_v42  ;;  %4350 = vrcp.f32 %v2925_v35  ;;  %v2215_v6 = vpop.f32.mrb[93].mxu1  ;;  %v2190_v3 = vadd.f32 %v5618_v62, %v5539_v25  ;;  %v3602_v20 = vmul.f32 -1.442695, %v2299_v63 }
 0x49d   :  { %v4333_v21 = vpop.eup %4332  ;;  %3241 = vst [vmem:[%s6277_s10 + $0xc0] sm:$0xff] %v4331_v43  ;;  %4352 = vpow2.f32 %v3586_v53  ;;  %v5724_v53 = vadd.f32 %v2213_v1, %v5533_v56  ;;  %v2328_v29 = vpop.f32.mrb[109].mxu0  ;;  %v5735_v16 = vadd.f32 %v2215_v6, %v5539_v25 }
 0x49e   :  { %v4335_v50 = vpop.eup %4334  ;;  %3245 = vst [vmem:[%s6277_s10 + $0xe0] sm:$0xff] %v4333_v21  ;;  %4354 = vpow2.f32 %v3588_v61  ;;  %v5727_v61 = vadd.f32 %v2326_v2, %v5536_v36  ;;  %v5738_v30 = vadd.f32 %v2328_v29, %v5542_v27  ;;  %v2217_v45 = vpop.f32.mrb[94].mxu1  ;;  %v3607_v35 = vmul.f32 -1.442695, %v2190_v3 }
 0x49f   :  { %v4337_v32 = vpop.eup %4336  ;;  %3247 = vst [vmem:[%s6277_s10 + $0xf0] sm:$0xff] %v4335_v50  ;;  %4356 = vpow2.f32 %v3592_v18  ;;  %v2330_v38 = vpop.f32.mrb[110].mxu0  ;;  %v5746_v60 = vadd.f32 %v2217_v45, %v5533_v56  ;;  %v3606_v56 = vmul.f32 -1.442695, %v2188_v19 }
 0x4a0   :  { %v4339_v22 = vpop.eup %4338  ;;  %3246 = vst [vmem:[%s6277_s10 + $0xe8] sm:$0xff] %v4337_v32  ;;  %4358 = vpow2.f32 %v3594_v51  ;;  %v2219_v18 = vpop.f32.mrb[95].mxu1  ;;  %v5752_v40 = vadd.f32 %v2330_v38, %v5536_v36  ;;  %v3608_v36 = vmul.f32 -1.442695, %v2301_v33 }
 0x4a1   :  { %v4341_v48 = vpop.eup %4340  ;;  %3248 = vst [vmem:[%s6277_s10 + $0xf8] sm:$0xff] %v4339_v22  ;;  %4360 = vpow2.f32 %v3593_v13  ;;  %v2332_v7 = vpop.f32.mrb[111].mxu0  ;;  %v5758_v62 = vadd.f32 %v2219_v18, %v5539_v25 }
 0x4a2   :  { %v4343_v17 = vpop.eup %4342  ;;  %3252 = vst [vmem:[%s6277_s10 + $0x118] sm:$0xff] %v4341_v48  ;;  %4362 = vpow2.f32 %v3595_v14  ;;  %v5761_v31 = vadd.f32 %v2332_v7, %v5542_v27  ;;  %v5769_v37 = vpop.f32.mrb[96].mxu1 }
 0x4a3   :  { %v4345_v23 = vpop.eup %4344  ;;  %3254 = vst [vmem:[%s6277_s10 + $0x128] sm:$0xff] %v4343_v17  ;;  %4364 = vpow2.f32 %v3599_v59  ;;  %v5771_v25 = vpop.f32.mrb[112].mxu0 }
 0x4a4   :  { %v4347_v58 = vpop.eup %4346  ;;  %3253 = vst [vmem:[%s6277_s10 + $0x120] sm:$0xff] %v4345_v23  ;;  %4366 = vpow2.f32 %v3601_v55  ;;  %v5776_v42 = vpop.f32.mrb[97].mxu1 }
 0x4a5   :  { %v4349_v34 = vpop.eup %4348  ;;  %3255 = vst [vmem:[%s6277_s10 + $0x130] sm:$0xff] %v4347_v58  ;;  %4368 = vpow2.f32 %v3600_v11  ;;  %v5778_v43 = vpop.f32.mrb[113].mxu0 }
 0x4a6   :  { %v4351_v27 = vpop.eup %4350  ;;  %3259 = vst [vmem:[%s6277_s10 + $0x150] sm:$0xff] %v4349_v34  ;;  %4370 = vpow2.f32 %v3602_v20  ;;  %v5783_v21 = vpop.f32.mrb[98].mxu1 }
 0x4a7   :  { %v4353_v51 = vpop.eup %4352  ;;  %3261 = vst [vmem:[%s6277_s10 + $0x160] sm:$0xff] %v4351_v27  ;;  %4372 = vpow2.f32 %v3606_v56  ;;  %v5785_v13 = vpop.f32.mrb[114].mxu0 }
 0x4a8   :  { %v4355_v14 = vpop.eup %4354  ;;  %v2924_v49 = vadd.f32 1.0, %v4353_v51  ;;  %4374 = vpow2.f32 %v3608_v36  ;;  %v5787_v50 = vpop.f32.mrb[99].mxu1 }
 0x4a9   :  { %v4357_v59 = vpop.eup %4356  ;;  %v2926_v55 = vadd.f32 1.0, %v4355_v14  ;;  %4376 = vpow2.f32 %v3607_v35  ;;  %v5789_v63 = vpop.f32.mrb[115].mxu0 }
 0x4aa   :  { %v4359_v1 = vpop.eup %4358  ;;  %4378 = vrcp.f32 %v2924_v49  ;;  %v2930_v2 = vadd.f32 1.0, %v4357_v59  ;;  %v5791_v45 = vpop.f32.mrb[100].mxu1 }
 0x4ab   :  { %v4361_v32 = vpop.eup %4360  ;;  %4380 = vrcp.f32 %v2926_v55  ;;  %v2932_v19 = vadd.f32 1.0, %v4359_v1  ;;  %v5793_v11 = vpop.f32.mrb[116].mxu0  ;;  %v3609_v55 = vmul.f32 -1.442695, %v5627_v4  ;;  %v3614_v4 = vmul.f32 -1.442695, %v5645_v57 }
 0x4ac   :  { %v4363_v6 = vpop.eup %4362  ;;  %4382 = vrcp.f32 %v2930_v2  ;;  %v2931_v29 = vadd.f32 1.0, %v4361_v32  ;;  %v5795_v3 = vpop.f32.mrb[101].mxu1  ;;  %v3613_v32 = vmul.f32 -1.442695, %v5639_v0  ;;  %v3620_v57 = vmul.f32 -1.442695, %v5655_v46 }
 0x4ad   :  { %v4365_v22 = vpop.eup %4364  ;;  %4384 = vrcp.f32 %v2932_v19  ;;  %v2933_v33 = vadd.f32 1.0, %v4363_v6  ;;  %v5797_v17 = vpop.f32.mrb[117].mxu0  ;;  %v3615_v6 = vmul.f32 -1.442695, %v5642_v15  ;;  %v3616_v15 = vmul.f32 -1.442695, %v5648_v9 }
 0x4ae   :  { %v4367_v38 = vpop.eup %4366  ;;  %4386 = vrcp.f32 %v2931_v29  ;;  %v2937_v48 = vadd.f32 1.0, %v4365_v22  ;;  %v5799_v20 = vpop.f32.mrb[102].mxu1  ;;  %v3622_v9 = vmul.f32 -1.442695, %v5658_v12  ;;  %v3621_v46 = vmul.f32 -1.442695, %v5661_v52 }
 0x4af   :  { %v4369_v18 = vpop.eup %4368  ;;  %4388 = vrcp.f32 %v2933_v33  ;;  %v2939_v7 = vadd.f32 1.0, %v4367_v38  ;;  %v5801_v58 = vpop.f32.mrb[118].mxu0  ;;  %v3627_v12 = vmul.f32 -1.442695, %v5673_v5  ;;  %v3629_v52 = vmul.f32 -1.442695, %v5676_v10 }
 0x4b0   :  { %v4371_v23 = vpop.eup %4370  ;;  %4390 = vrcp.f32 %v2937_v48  ;;  %v2938_v56 = vadd.f32 1.0, %v4369_v18  ;;  %v5803_v36 = vpop.f32.mrb[103].mxu1  ;;  %v3628_v5 = vmul.f32 -1.442695, %v5679_v44 }
 0x4b1   :  { %v4373_v34 = vpop.eup %4372  ;;  %4392 = vrcp.f32 %v2939_v7  ;;  %v2940_v35 = vadd.f32 1.0, %v4371_v23  ;;  %v5805_v27 = vpop.f32.mrb[119].mxu0 }
 0x4b2   :  { %v4375_v51 = vpop.eup %4374  ;;  %4394 = vrcp.f32 %v2938_v56  ;;  %v2944_v14 = vadd.f32 1.0, %v4373_v34  ;;  %v5813_v29 = vpop.f32.mrb[104].mxu1 }
 0x4b3   :  { %v4377_v49 = vpop.eup %4376  ;;  %4396 = vrcp.f32 %v2940_v35  ;;  %v2946_v59 = vadd.f32 1.0, %v4375_v51  ;;  %v5815_v22 = vpop.f32.mrb[120].mxu0 }
 0x4b4   :  { %v4379_v1 = vpop.eup %4378  ;;  %4398 = vrcp.f32 %v2944_v14  ;;  %v2945_v2 = vadd.f32 1.0, %v4377_v49  ;;  %v5821_v0 = vpop.f32.mrb[105].mxu1  ;;  %v1804_v14 = vsub.s32 4, %v5521_v47 }
 0x4b5   :  { %v4381_v19 = vpop.eup %4380  ;;  %3260 = vst [vmem:[%s6277_s10 + $0x158] sm:$0xff] %v4379_v1  ;;  %4400 = vrcp.f32 %v2946_v59  ;;  %v5823_v38 = vpop.f32.mrb[121].mxu0  ;;  %v3623_v59 = vmul.f32 -1.442695, %v5664_v26 }
 0x4b6   :  { %v4383_v33 = vpop.eup %4382  ;;  %3262 = vst [vmem:[%s6277_s10 + $0x168] sm:$0xff] %v4381_v19  ;;  %4402 = vrcp.f32 %v2945_v2  ;;  %v5829_v18 = vpop.f32.mrb[106].mxu1  ;;  %v5871_v19 = vrot.slane %v5528_v24, %v1804_v14 }
 0x4b7   :  { %v4385_v48 = vpop.eup %4384  ;;  %3266 = vst [vmem:[%s6277_s10 + $0x188] sm:$0xff] %v4383_v33  ;;  %4404 = vpow2.f32 %v3609_v55  ;;  %v5831_v7 = vpop.f32.mrb[122].mxu0 }
 0x4b8   :  { %v4387_v23 = vpop.eup %4386  ;;  %3268 = vst [vmem:[%s6277_s10 + $0x198] sm:$0xff] %v4385_v48  ;;  %4406 = vpow2.f32 %v3613_v32  ;;  %v5837_v56 = vpop.f32.mrb[107].mxu1 }
 0x4b9   :  { %v5839_v34 = vpop.f32.mrb[123].mxu0  ;;  %v4389_v35 = vpop.eup %4388  ;;  %3267 = vst [vmem:[%s6277_s10 + $0x190] sm:$0xff] %v4387_v23  ;;  %4408 = vpow2.f32 %v3615_v6 }
 0x4ba   :  { %v4391_v51 = vpop.eup %4390  ;;  %3269 = vst [vmem:[%s6277_s10 + $0x1a0] sm:$0xff] %v4389_v35  ;;  %4410 = vpow2.f32 %v3614_v4  ;;  %v5862_v2 = vpop.f32.mrb[108].mxu1  ;;  %v3630_v4 = vmul.f32 -1.442695, %v5682_v41 }
 0x4bb   :  { %v4393_v49 = vpop.eup %4392  ;;  %3273 = vst [vmem:[%s6277_s10 + $0x1c0] sm:$0xff] %v4391_v51  ;;  %4412 = vpow2.f32 %v3616_v15  ;;  %v5864_v32 = vpop.f32.mrb[124].mxu0 }
 0x4bc   :  { %v4395_v55 = vpop.eup %4394  ;;  %3275 = vst [vmem:[%s6277_s10 + $0x1d0] sm:$0xff] %v4393_v49  ;;  %4414 = vpow2.f32 %v3620_v57  ;;  %v5873_v6 = vpop.f32.mrb[109].mxu1 }
 0x4bd   :  { %v4397_v1 = vpop.eup %4396  ;;  %3274 = vst [vmem:[%s6277_s10 + $0x1c8] sm:$0xff] %v4395_v55  ;;  %4416 = vpow2.f32 %v3622_v9  ;;  %v5875_v33 = vpop.f32.mrb[125].mxu0 }
 0x4be   :  { %v4399_v26 = vpop.eup %4398  ;;  %3276 = vst [vmem:[%s6277_s10 + $0x1d8] sm:$0xff] %v4397_v1  ;;  %4418 = vpow2.f32 %v3621_v46  ;;  %v2403_v48 = vpop.f32.mrb[110].mxu1 }
 0x4bf   :  { %v4401_v10 = vpop.eup %4400  ;;  %3280 = vst [vmem:[%s6277_s10 + $0x1f8] sm:$0xff] %v4399_v26  ;;  %4420 = vpow2.f32 %v3623_v59  ;;  %v5881_v15 = vpop.f32.mrb[126].mxu0  ;;  %v5887_v24 = vadd.f32 %v2403_v48, %v5871_v19 }
 0x4c0   :  { %v4403_v23 = vpop.eup %4402  ;;  %3282 = vst [vmem:[%s6277_s10 + $0x208] sm:$0xff] %v4401_v10  ;;  %4422 = vpow2.f32 %v3627_v12  ;;  %v5889_v44 = vpop.f32.mrb[111].mxu1 }
 0x4c1   :  { %v5891_v57 = vpop.f32.mrb[127].mxu0  ;;  %v4405_v35 = vpop.eup %4404  ;;  %3281 = vst [vmem:[%s6277_s10 + $0x200] sm:$0xff] %v4403_v23  ;;  %4424 = vpow2.f32 %v3629_v52 }
 0x4c2   :  { %v4407_v41 = vpop.eup %4406  ;;  %v2947_v9 = vadd.f32 1.0, %v4405_v35  ;;  %4426 = vpow2.f32 %v3628_v5  ;;  %v2409_v12 = vpop.f32.mrb[112].mxu1 }
 0x4c3   :  { %v4409_v51 = vpop.eup %4408  ;;  %v2951_v46 = vadd.f32 1.0, %v4407_v41  ;;  %4428 = vpow2.f32 %v3630_v4  ;;  %v5897_v10 = vadd.f32 %v2409_v12, %v5871_v19  ;;  %v5899_v52 = vpop.f32.mrb[113].mxu1 }
 0x4c4   :  { %v4411_v14 = vpop.eup %4410  ;;  %4430 = vrcp.f32 %v2947_v9  ;;  %v2953_v49 = vadd.f32 1.0, %v4409_v51  ;;  %v2413_v23 = vpop.f32.mrb[114].mxu1 }
 0x4c5   :  { %v4413_v59 = vpop.eup %4412  ;;  %4432 = vrcp.f32 %v2951_v46  ;;  %v2952_v55 = vadd.f32 1.0, %v4411_v14  ;;  %6279 = vst [vmem:[#allocation5_spill] sm:$0xff] %v5897_v10  ;;  %v5902_v41 = vadd.f32 %v2413_v23, %v5871_v19  ;;  %v5904_v9 = vpop.f32.mrb[115].mxu1 }
 0x4c6   :  { %v4415_v1 = vpop.eup %4414  ;;  %4434 = vrcp.f32 %v2953_v49  ;;  %v2954_v26 = vadd.f32 1.0, %v4413_v59  ;;  %6281 = vst [vmem:[#allocation7_spill] sm:$0xff] %v5904_v9 }
 0x4c7   :  { %v4417_v48 = vpop.eup %4416  ;;  %4436 = vrcp.f32 %v2952_v55  ;;  %v2958_v5 = vadd.f32 1.0, %v4415_v1  ;;  %6280 = vst [vmem:[#allocation6_spill] sm:$0xff] %v5902_v41  ;;  %v1808_v55 = vsub.s32 5, %v5521_v47  ;;  %v3634_v41 = vmul.f32 -1.442695, %v5691_v39  ;;  %v5921_v39 = vld [vmem:[%s6276_s9] sm:$0xff] }
 0x4c8   :  { %v4419_v4 = vpop.eup %4418  ;;  %4438 = vrcp.f32 %v2954_v26  ;;  %v2960_v35 = vadd.f32 1.0, %v4417_v48 }
 0x4c9   :  { %v4421_v51 = vpop.eup %4420  ;;  %4440 = vrcp.f32 %v2958_v5  ;;  %v2959_v46 = vadd.f32 1.0, %v4419_v4  ;;  %v3636_v4 = vmul.f32 -1.442695, %v5697_v54  ;;  %v5924_v54 = vrot.slane %v5921_v39, %v1808_v55 }
 0x4ca   :  { %v4423_v14 = vpop.eup %4422  ;;  %4442 = vrcp.f32 %v2960_v35  ;;  %v2961_v49 = vadd.f32 1.0, %v4421_v51  ;;  %v2419_v10 = vpop.f32.mrb[116].mxu1  ;;  %v3641_v55 = vmul.f32 -1.442695, %v5724_v53 }
 0x4cb   :  { %v4425_v59 = vpop.eup %4424  ;;  %4444 = vrcp.f32 %v2959_v46  ;;  %v2965_v12 = vadd.f32 1.0, %v4423_v14  ;;  %v5910_v35 = vadd.f32 %v2419_v10, %v5871_v19  ;;  %v5912_v51 = vpop.f32.mrb[117].mxu1  ;;  %v3635_v14 = vmul.f32 -1.442695, %v5700_v28 }
 0x4cc   :  { %v4427_v1 = vpop.eup %4426  ;;  %4446 = vrcp.f32 %v2961_v49  ;;  %v2967_v26 = vadd.f32 1.0, %v4425_v59  ;;  %v2423_v10 = vpop.f32.mrb[118].mxu1 }
 0x4cd   :  { %v4429_v48 = vpop.eup %4428  ;;  %4448 = vrcp.f32 %v2965_v12  ;;  %v2966_v23 = vadd.f32 1.0, %v4427_v1  ;;  %v5931_v59 = vadd.f32 %v2423_v10, %v5871_v19  ;;  %v2425_v28 = vpop.f32.mrb[119].mxu1 }
 0x4ce   :  { %v4431_v9 = vpop.eup %4430  ;;  %4450 = vrcp.f32 %v2967_v26  ;;  %v2968_v5 = vadd.f32 1.0, %v4429_v48  ;;  %v5938_v1 = vadd.f32 %v2425_v28, %v5924_v54 }
 0x4cf   :  { %v4433_v46 = vpop.eup %4432  ;;  %3283 = vst [vmem:[%s6277_s10 + $0x210] sm:$0xff] %v4431_v9  ;;  %4452 = vrcp.f32 %v2966_v23  ;;  %v3637_v9 = vmul.f32 -1.442695, %v5703_v8  ;;  %v3643_v8 = vmul.f32 -1.442695, %v5727_v61 }
 0x4d0   :  { %v4435_v49 = vpop.eup %4434  ;;  %3287 = vst [vmem:[%s6277_s10 + $0x230] sm:$0xff] %v4433_v46  ;;  %4454 = vrcp.f32 %v2968_v5  ;;  %v3644_v23 = vmul.f32 -1.442695, %v5738_v30  ;;  %v3648_v61 = vmul.f32 -1.442695, %v5746_v60 }
 0x4d1   :  { %v4437_v12 = vpop.eup %4436  ;;  %3289 = vst [vmem:[%s6277_s10 + $0x240] sm:$0xff] %v4435_v49  ;;  %4456 = vpow2.f32 %v3634_v41  ;;  %v3642_v41 = vmul.f32 -1.442695, %v5735_v16  ;;  %v3650_v30 = vmul.f32 -1.442695, %v5752_v40 }
 0x4d2   :  { %v4439_v26 = vpop.eup %4438  ;;  %3288 = vst [vmem:[%s6277_s10 + $0x238] sm:$0xff] %v4437_v12  ;;  %4458 = vpow2.f32 %v3636_v4  ;;  %v2370_v4 = vadd.f32 %v5769_v37, %v5871_v19  ;;  %v2429_v16 = vpop.f32.mrb[120].mxu1  ;;  %v3649_v60 = vmul.f32 -1.442695, %v5758_v62  ;;  %v3651_v40 = vmul.f32 -1.442695, %v5761_v31 }
 0x4d3   :  { %v4441_v48 = vpop.eup %4440  ;;  %3290 = vst [vmem:[%s6277_s10 + $0x248] sm:$0xff] %v4439_v26  ;;  %4460 = vpow2.f32 %v3635_v14  ;;  %v5963_v14 = vadd.f32 %v2429_v16, %v5871_v19  ;;  %v2431_v10 = vpop.f32.mrb[121].mxu1 }
 0x4d4   :  { %v4443_v53 = vpop.eup %4442  ;;  %3294 = vst [vmem:[%s6277_s10 + $0x268] sm:$0xff] %v4441_v48  ;;  %4462 = vpow2.f32 %v3637_v9  ;;  %v5970_v37 = vadd.f32 %v2431_v10, %v5924_v54  ;;  %v2433_v9 = vpop.f32.mrb[122].mxu1  ;;  %v3547_v62 = vmul.f32 -1.442695, %v2370_v4 }
 0x4d5   :  { %v4445_v5 = vpop.eup %4444  ;;  %3296 = vst [vmem:[%s6277_s10 + $0x278] sm:$0xff] %v4443_v53  ;;  %4464 = vpow2.f32 %v3641_v55  ;;  %v5977_v12 = vadd.f32 %v2433_v9, %v5871_v19  ;;  %v2435_v55 = vpop.f32.mrb[123].mxu1 }
 0x4d6   :  { %v4447_v46 = vpop.eup %4446  ;;  %3295 = vst [vmem:[%s6277_s10 + $0x270] sm:$0xff] %v4445_v5  ;;  %4466 = vpow2.f32 %v3643_v8  ;;  %v5983_v8 = vadd.f32 %v2435_v55, %v5924_v54 }
 0x4d7   :  { %v4449_v49 = vpop.eup %4448  ;;  %3297 = vst [vmem:[%s6277_s10 + $0x280] sm:$0xff] %v4447_v46  ;;  %4468 = vpow2.f32 %v3642_v41  ;;  %v1812_v41 = vsub.s32 6, %v5521_v47 }
 0x4d8   :  { %v4451_v28 = vpop.eup %4450  ;;  %3301 = vst [vmem:[%s6277_s10 + $0x2a0] sm:$0xff] %v4449_v49  ;;  %4470 = vpow2.f32 %v3644_v23 }
 0x4d9   :  { %v4453_v26 = vpop.eup %4452  ;;  %3303 = vst [vmem:[%s6277_s10 + $0x2b0] sm:$0xff] %v4451_v28  ;;  %4472 = vpow2.f32 %v3648_v61 }
 0x4da   :  { %v4455_v48 = vpop.eup %4454  ;;  %3302 = vst [vmem:[%s6277_s10 + $0x2a8] sm:$0xff] %v4453_v26  ;;  %4474 = vpow2.f32 %v3650_v30  ;;  %v2439_v4 = vpop.f32.mrb[124].mxu1 }
 0x4db   :  { %v4457_v31 = vpop.eup %4456  ;;  %3304 = vst [vmem:[%s6277_s10 + $0x2b8] sm:$0xff] %v4455_v48  ;;  %4476 = vpow2.f32 %v3649_v60  ;;  %v5993_v30 = vadd.f32 %v2439_v4, %v5871_v19  ;;  %v2441_v10 = vpop.f32.mrb[125].mxu1  ;;  %v5996_v60 = vrot.slane %v5921_v39, %v1812_v41 }
 0x4dc   :  { %v4459_v53 = vpop.eup %4458  ;;  %v2972_v23 = vadd.f32 1.0, %v4457_v31  ;;  %4478 = vpow2.f32 %v3651_v40  ;;  %v5999_v47 = vadd.f32 %v2441_v10, %v5924_v54  ;;  %v2443_v28 = vpop.f32.mrb[126].mxu1 }
 0x4dd   :  { %v4461_v5 = vpop.eup %4460  ;;  %v2974_v61 = vadd.f32 1.0, %v4459_v53  ;;  %4480 = vpow2.f32 %v3547_v62  ;;  %v6002_v26 = vadd.f32 %v2443_v28, %v5871_v19  ;;  %v2445_v62 = vpop.f32.mrb[127].mxu1 }
 0x4de   :  { %v4463_v16 = vpop.eup %4462  ;;  %4482 = vrcp.f32 %v2972_v23  ;;  %v2973_v46 = vadd.f32 1.0, %v4461_v5  ;;  %v6005_v53 = vadd.f32 %v2445_v62, %v5924_v54 }
 0x4df   :  { %v4465_v49 = vpop.eup %4464  ;;  %4484 = vrcp.f32 %v2974_v61  ;;  %v2975_v9 = vadd.f32 1.0, %v4463_v16  ;;  %v2491_v61 = vadd.f32 %v5771_v25, %v5996_v60 }
 0x4e0   :  { %v4467_v40 = vpop.eup %4466  ;;  %4486 = vrcp.f32 %v2973_v46  ;;  %v2979_v55 = vadd.f32 1.0, %v4465_v49  ;;  %v2372_v46 = vadd.f32 %v5776_v42, %v5924_v54 }
 0x4e1   :  { %v4469_v48 = vpop.eup %4468  ;;  %4488 = vrcp.f32 %v2975_v9  ;;  %v2981_v31 = vadd.f32 1.0, %v4467_v40  ;;  %v2483_v9 = vadd.f32 %v5778_v43, %v5996_v60  ;;  %v2376_v43 = vadd.f32 %v5787_v50, %v5924_v54 }
 0x4e2   :  { %v4471_v23 = vpop.eup %4470  ;;  %4490 = vrcp.f32 %v2979_v55  ;;  %v2980_v39 = vadd.f32 1.0, %v4469_v48  ;;  %v2374_v55 = vadd.f32 %v5783_v21, %v5871_v19  ;;  %v3563_v48 = vmul.f32 -1.442695, %v2491_v61 }
 0x4e3   :  { %v4473_v41 = vpop.eup %4472  ;;  %4492 = vrcp.f32 %v2981_v31  ;;  %v2982_v5 = vadd.f32 1.0, %v4471_v23  ;;  %v2494_v31 = vadd.f32 %v5785_v13, %v5996_v60  ;;  %v3549_v21 = vmul.f32 -1.442695, %v2483_v9 }
 0x4e4   :  { %v4475_v4 = vpop.eup %4474  ;;  %4494 = vrcp.f32 %v2980_v39  ;;  %v2986_v16 = vadd.f32 1.0, %v4473_v41  ;;  %v3548_v39 = vmul.f32 -1.442695, %v2372_v46  ;;  %v3554_v13 = vmul.f32 -1.442695, %v2374_v55 }
 0x4e5   :  { %v4477_v10 = vpop.eup %4476  ;;  %4496 = vrcp.f32 %v2982_v5  ;;  %v2988_v49 = vadd.f32 1.0, %v4475_v4  ;;  %v2486_v5 = vadd.f32 %v5789_v63, %v5996_v60  ;;  %v2380_v50 = vadd.f32 %v5791_v45, %v5871_v19 }
 0x4e6   :  { %v4479_v28 = vpop.eup %4478  ;;  %4498 = vrcp.f32 %v2986_v16  ;;  %v2987_v40 = vadd.f32 1.0, %v4477_v10  ;;  %v3570_v16 = vmul.f32 -1.442695, %v2494_v31  ;;  %v2507_v63 = vadd.f32 %v5793_v11, %v5996_v60 }
 0x4e7   :  { %v4481_v62 = vpop.eup %4480  ;;  %4500 = vrcp.f32 %v2988_v49  ;;  %v2989_v25 = vadd.f32 1.0, %v4479_v28  ;;  %v3555_v10 = vmul.f32 -1.442695, %v2376_v43  ;;  %v2382_v45 = vadd.f32 %v5795_v3, %v5924_v54 }
 0x4e8   :  { %v4483_v42 = vpop.eup %4482  ;;  %4502 = vrcp.f32 %v2987_v40  ;;  %v2885_v23 = vadd.f32 1.0, %v4481_v62  ;;  %v3556_v9 = vmul.f32 -1.442695, %v2486_v5  ;;  %v2499_v11 = vadd.f32 %v5797_v17, %v5996_v60 }
 0x4e9   :  { %v4485_v41 = vpop.eup %4484  ;;  %3308 = vst [vmem:[%s6277_s10 + $0x2d8] sm:$0xff] %v4483_v42  ;;  %4504 = vrcp.f32 %v2989_v25  ;;  %v3561_v40 = vmul.f32 -1.442695, %v2380_v50  ;;  %v2384_v3 = vadd.f32 %v5799_v20, %v5871_v19  ;;  %v3591_v62 = vmul.f32 -1.442695, %v2507_v63 }
 0x4ea   :  { %v4487_v61 = vpop.eup %4486  ;;  %3310 = vst [vmem:[%s6277_s10 + $0x2e8] sm:$0xff] %v4485_v41  ;;  %4506 = vrcp.f32 %v2885_v23  ;;  %v2510_v17 = vadd.f32 %v5801_v58, %v5996_v60  ;;  %v3577_v20 = vmul.f32 -1.442695, %v2499_v11 }
 0x4eb   :  { %v4489_v4 = vpop.eup %4488  ;;  %3309 = vst [vmem:[%s6277_s10 + $0x2e0] sm:$0xff] %v4487_v61  ;;  %4508 = vpow2.f32 %v3563_v48  ;;  %v3562_v48 = vmul.f32 -1.442695, %v2382_v45  ;;  %v3568_v58 = vmul.f32 -1.442695, %v2384_v3  ;;  %v2386_v3 = vadd.f32 %v5803_v36, %v5924_v54 }
 0x4ec   :  { %v4491_v46 = vpop.eup %4490  ;;  %3311 = vst [vmem:[%s6277_s10 + $0x2f0] sm:$0xff] %v4489_v4  ;;  %4510 = vpow2.f32 %v3548_v39  ;;  %v3598_v39 = vmul.f32 -1.442695, %v2510_v17  ;;  %v2502_v17 = vadd.f32 %v5805_v27, %v5996_v60 }
 0x4ed   :  { %v4493_v49 = vpop.eup %4492  ;;  %3315 = vst [vmem:[%s6277_s10 + $0x310] sm:$0xff] %v4491_v46  ;;  %4512 = vpow2.f32 %v3549_v21 }
 0x4ee   :  { %v4495_v28 = vpop.eup %4494  ;;  %3317 = vst [vmem:[%s6277_s10 + $0x320] sm:$0xff] %v4493_v49  ;;  %4514 = vpow2.f32 %v3554_v13 }
 0x4ef   :  { %v4497_v55 = vpop.eup %4496  ;;  %3316 = vst [vmem:[%s6277_s10 + $0x318] sm:$0xff] %v4495_v28  ;;  %4516 = vpow2.f32 %v3570_v16 }
 0x4f0   :  { %v4499_v25 = vpop.eup %4498  ;;  %3318 = vst [vmem:[%s6277_s10 + $0x328] sm:$0xff] %v4497_v55  ;;  %4518 = vpow2.f32 %v3555_v10 }
 0x4f1   :  { %v4501_v31 = vpop.eup %4500  ;;  %3322 = vst [vmem:[%s6277_s10 + $0x348] sm:$0xff] %v4499_v25  ;;  %4520 = vpow2.f32 %v3556_v9 }
 0x4f2   :  { %v4503_v42 = vpop.eup %4502  ;;  %3324 = vst [vmem:[%s6277_s10 + $0x358] sm:$0xff] %v4501_v31  ;;  %4522 = vpow2.f32 %v3561_v40  ;;  %v2390_v31 = vadd.f32 %v5813_v29, %v5871_v19  ;;  %v2515_v29 = vadd.f32 %v5823_v38, %v5996_v60  ;;  %v2526_v38 = vadd.f32 %v5831_v7, %v5996_v60 }
 0x4f3   :  { %v4505_v23 = vpop.eup %4504  ;;  %3323 = vst [vmem:[%s6277_s10 + $0x350] sm:$0xff] %v4503_v42  ;;  %4524 = vpow2.f32 %v3591_v62  ;;  %v2518_v7 = vadd.f32 %v5839_v34, %v5996_v60  ;;  %v2539_v34 = vadd.f32 %v5864_v32, %v5996_v60 }
 0x4f4   :  { %v4507_v43 = vpop.eup %4506  ;;  %3325 = vst [vmem:[%s6277_s10 + $0x360] sm:$0xff] %v4505_v23  ;;  %4526 = vpow2.f32 %v3562_v48 }
 0x4f5   :  { %v4509_v41 = vpop.eup %4508  ;;  %3221 = vst [vmem:[%s6277_s10 + $0x20] sm:$0xff] %v4507_v43  ;;  %4528 = vpow2.f32 %v3577_v20  ;;  %v2392_v43 = vadd.f32 %v5821_v0, %v5924_v54 }
 0x4f6   :  { %v4511_v21 = vpop.eup %4510  ;;  %v2901_v5 = vadd.f32 1.0, %v4509_v41  ;;  %4530 = vpow2.f32 %v3568_v58  ;;  %v2523_v58 = vadd.f32 %v5815_v22, %v5996_v60  ;;  %v3575_v22 = vmul.f32 -1.442695, %v2390_v31 }
 0x4f7   :  { %v4513_v61 = vpop.eup %4512  ;;  %v2886_v13 = vadd.f32 1.0, %v4511_v21  ;;  %4532 = vpow2.f32 %v3598_v39  ;;  %v3569_v39 = vmul.f32 -1.442695, %v2386_v3  ;;  %v3584_v21 = vmul.f32 -1.442695, %v2502_v17 }
 0x4f8   :  { %v4515_v50 = vpop.eup %4514  ;;  %4534 = vrcp.f32 %v2901_v5  ;;  %v2887_v4 = vadd.f32 1.0, %v4513_v61  ;;  %v2394_v61 = vadd.f32 %v5829_v18, %v5871_v19  ;;  %v3619_v0 = vmul.f32 -1.442695, %v2523_v58 }
 0x4f9   :  { %v4517_v16 = vpop.eup %4516  ;;  %4536 = vrcp.f32 %v2886_v13  ;;  %v2892_v63 = vadd.f32 1.0, %v4515_v50  ;;  %v2396_v18 = vadd.f32 %v5837_v56, %v5924_v54  ;;  %v2400_v56 = vadd.f32 %v5862_v2, %v5871_v19 }
 0x4fa   :  { %v4519_v46 = vpop.eup %4518  ;;  %4538 = vrcp.f32 %v2887_v4  ;;  %v2908_v10 = vadd.f32 1.0, %v4517_v16  ;;  %v3576_v4 = vmul.f32 -1.442695, %v2392_v43  ;;  %v2402_v2 = vadd.f32 %v5873_v6, %v5924_v54 }
 0x4fb   :  { %v4521_v45 = vpop.eup %4520  ;;  %4540 = vrcp.f32 %v2892_v63  ;;  %v2893_v49 = vadd.f32 1.0, %v4519_v46  ;;  %v3605_v63 = vmul.f32 -1.442695, %v2515_v29  ;;  %v3589_v32 = vmul.f32 -1.442695, %v2400_v56 }
 0x4fc   :  { %v4523_v9 = vpop.eup %4522  ;;  %4542 = vrcp.f32 %v2908_v10  ;;  %v2894_v11 = vadd.f32 1.0, %v4521_v45  ;;  %v3582_v10 = vmul.f32 -1.442695, %v2394_v61  ;;  %v3647_v6 = vmul.f32 -1.442695, %v2539_v34 }
 0x4fd   :  { %v4525_v28 = vpop.eup %4524  ;;  %4544 = vrcp.f32 %v2893_v49  ;;  %v2899_v40 = vadd.f32 1.0, %v4523_v9  ;;  %v3626_v49 = vmul.f32 -1.442695, %v2526_v38  ;;  %v3596_v34 = vmul.f32 -1.442695, %v5887_v24 }
 0x4fe   :  { %v4527_v55 = vpop.eup %4526  ;;  %4546 = vrcp.f32 %v2894_v11  ;;  %v2929_v62 = vadd.f32 1.0, %v4525_v28  ;;  %v3583_v11 = vmul.f32 -1.442695, %v2396_v18  ;;  %v3612_v28 = vmul.f32 -1.442695, %v2518_v7 }
 0x4ff   :  { %v4529_v25 = vpop.eup %4528  ;;  %4548 = vrcp.f32 %v2899_v40  ;;  %v2900_v48 = vadd.f32 1.0, %v4527_v55  ;;  %v2542_v18 = vadd.f32 %v5881_v15, %v5996_v60  ;;  %v2406_v7 = vadd.f32 %v5889_v44, %v5924_v54 }
 0x500   :  { %v4531_v20 = vpop.eup %4530  ;;  %4550 = vrcp.f32 %v2929_v62  ;;  %v2915_v42 = vadd.f32 1.0, %v4529_v25  ;;  %v3590_v62 = vmul.f32 -1.442695, %v2402_v2  ;;  %v2412_v44 = vadd.f32 %v5899_v52, %v5924_v54  ;;  %v6282_v2 = vld [vmem:[#allocation7_spill] sm:$0xff]  ;;  %v6283_v52 = vld [vmem:[#allocation5_spill] sm:$0xff] }
 0x501   :  { %v4533_v23 = vpop.eup %4532  ;;  %4552 = vrcp.f32 %v2900_v48  ;;  %v2906_v36 = vadd.f32 1.0, %v4531_v20  ;;  %v3654_v15 = vmul.f32 -1.442695, %v2542_v18 }
 0x502   :  { %v4535_v27 = vpop.eup %4534  ;;  %4554 = vrcp.f32 %v2915_v42  ;;  %v2936_v41 = vadd.f32 1.0, %v4533_v23 }
 0x503   :  { %v4537_v5 = vpop.eup %4536  ;;  %3237 = vst [vmem:[%s6277_s10 + $0xa0] sm:$0xff] %v4535_v27  ;;  %4556 = vrcp.f32 %v2906_v36 }
 0x504   :  { %v4539_v13 = vpop.eup %4538  ;;  %3222 = vst [vmem:[%s6277_s10 + $0x28] sm:$0xff] %v4537_v5  ;;  %4558 = vrcp.f32 %v2936_v41 }
 0x505   :  { %v4541_v50 = vpop.eup %4540  ;;  %3223 = vst [vmem:[%s6277_s10 + $0x30] sm:$0xff] %v4539_v13  ;;  %4560 = vpow2.f32 %v3569_v39  ;;  %v2531_v13 = vadd.f32 %v5875_v33, %v5996_v60  ;;  %v2534_v33 = vadd.f32 %v5891_v57, %v5996_v60  ;;  %v3597_v57 = vmul.f32 -1.442695, %v2406_v7 }
 0x506   :  { %v4543_v16 = vpop.eup %4542  ;;  %3228 = vst [vmem:[%s6277_s10 + $0x58] sm:$0xff] %v4541_v50  ;;  %4562 = vpow2.f32 %v3584_v21 }
 0x507   :  { %v4545_v46 = vpop.eup %4544  ;;  %3244 = vst [vmem:[%s6277_s10 + $0xd8] sm:$0xff] %v4543_v16  ;;  %4564 = vpow2.f32 %v3575_v22  ;;  %v3633_v56 = vmul.f32 -1.442695, %v2531_v13  ;;  %v3640_v24 = vmul.f32 -1.442695, %v2534_v33 }
 0x508   :  { %v4547_v45 = vpop.eup %4546  ;;  %3229 = vst [vmem:[%s6277_s10 + $0x60] sm:$0xff] %v4545_v46  ;;  %4566 = vpow2.f32 %v3619_v0 }
 0x509   :  { %v4549_v9 = vpop.eup %4548  ;;  %3230 = vst [vmem:[%s6277_s10 + $0x68] sm:$0xff] %v4547_v45  ;;  %4568 = vpow2.f32 %v3576_v4 }
 0x50a   :  { %v4551_v19 = vpop.eup %4550  ;;  %3235 = vst [vmem:[%s6277_s10 + $0x90] sm:$0xff] %v4549_v9  ;;  %4570 = vpow2.f32 %v3605_v63 }
 0x50b   :  { %v4553_v40 = vpop.eup %4552  ;;  %3265 = vst [vmem:[%s6277_s10 + $0x180] sm:$0xff] %v4551_v19  ;;  %4572 = vpow2.f32 %v3582_v10  ;;  %v2416_v19 = vadd.f32 %v6282_v2, %v5924_v54 }
 0x50c   :  { %v4555_v3 = vpop.eup %4554  ;;  %3236 = vst [vmem:[%s6277_s10 + $0x98] sm:$0xff] %v4553_v40  ;;  %4574 = vpow2.f32 %v3626_v49  ;;  %v3603_v40 = vmul.f32 -1.442695, %v6283_v52 }
 0x50d   :  { %v4557_v55 = vpop.eup %4556  ;;  %3251 = vst [vmem:[%s6277_s10 + $0x110] sm:$0xff] %v4555_v3  ;;  %4576 = vpow2.f32 %v3583_v11  ;;  %v3604_v3 = vmul.f32 -1.442695, %v2412_v44 }
 0x50e   :  { %v4559_v17 = vpop.eup %4558  ;;  %3242 = vst [vmem:[%s6277_s10 + $0xc8] sm:$0xff] %v4557_v55  ;;  %4578 = vpow2.f32 %v3612_v28 }
 0x50f   :  { %v4561_v25 = vpop.eup %4560  ;;  %3272 = vst [vmem:[%s6277_s10 + $0x1b8] sm:$0xff] %v4559_v17  ;;  %4580 = vpow2.f32 %v3589_v32 }
 0x510   :  { %v4563_v48 = vpop.eup %4562  ;;  %v2907_v31 = vadd.f32 1.0, %v4561_v25  ;;  %4582 = vpow2.f32 %v3647_v6  ;;  %v2422_v6 = vadd.f32 %v5912_v51, %v5924_v54  ;;  %v3617_v51 = vmul.f32 -1.442695, %v5910_v35 }
 0x511   :  { %v4565_v20 = vpop.eup %4564  ;;  %v2922_v42 = vadd.f32 1.0, %v4563_v48  ;;  %4584 = vpow2.f32 %v3590_v62  ;;  %v6284_v62 = vld [vmem:[#allocation6_spill] sm:$0xff]  ;;  %v3611_v48 = vmul.f32 -1.442695, %v2416_v19  ;;  %v3625_v35 = vmul.f32 -1.442695, %v5938_v1 }
 0x512   :  { %v4567_v58 = vpop.eup %4566  ;;  %4586 = vrcp.f32 %v2907_v31  ;;  %v2913_v23 = vadd.f32 1.0, %v4565_v20  ;;  %v3610_v17 = vmul.f32 -1.442695, %v6284_v62  ;;  %v3618_v20 = vmul.f32 -1.442695, %v2422_v6 }
 0x513   :  { %v4569_v36 = vpop.eup %4568  ;;  %4588 = vrcp.f32 %v2922_v42  ;;  %v2957_v39 = vadd.f32 1.0, %v4567_v58  ;;  %v3624_v58 = vmul.f32 -1.442695, %v5931_v59 }
 0x514   :  { %v4571_v43 = vpop.eup %4570  ;;  %4590 = vrcp.f32 %v2913_v23  ;;  %v2914_v27 = vadd.f32 1.0, %v4569_v36 }
 0x515   :  { %v4573_v41 = vpop.eup %4572  ;;  %4592 = vrcp.f32 %v2957_v39  ;;  %v2943_v21 = vadd.f32 1.0, %v4571_v43 }
 0x516   :  { %v4575_v29 = vpop.eup %4574  ;;  %4594 = vrcp.f32 %v2914_v27  ;;  %v2920_v5 = vadd.f32 1.0, %v4573_v41 }
 0x517   :  { %v4577_v22 = vpop.eup %4576  ;;  %4596 = vrcp.f32 %v2943_v21  ;;  %v2964_v61 = vadd.f32 1.0, %v4575_v29 }
 0x518   :  { %v4579_v0 = vpop.eup %4578  ;;  %4598 = vrcp.f32 %v2920_v5  ;;  %v2921_v38 = vadd.f32 1.0, %v4577_v22 }
 0x519   :  { %v4581_v50 = vpop.eup %4580  ;;  %4600 = vrcp.f32 %v2964_v61  ;;  %v2950_v4 = vadd.f32 1.0, %v4579_v0 }
 0x51a   :  { %v4583_v16 = vpop.eup %4582  ;;  %4602 = vrcp.f32 %v2921_v38  ;;  %v2927_v63 = vadd.f32 1.0, %v4581_v50 }
 0x51b   :  { %v4585_v46 = vpop.eup %4584  ;;  %4604 = vrcp.f32 %v2950_v4  ;;  %v2985_v10 = vadd.f32 1.0, %v4583_v16 }
 0x51c   :  { %v4587_v45 = vpop.eup %4586  ;;  %4606 = vrcp.f32 %v2927_v63  ;;  %v2928_v49 = vadd.f32 1.0, %v4585_v46 }
 0x51d   :  { %v4589_v9 = vpop.eup %4588  ;;  %3243 = vst [vmem:[%s6277_s10 + $0xd0] sm:$0xff] %v4587_v45  ;;  %4608 = vrcp.f32 %v2985_v10 }
 0x51e   :  { %v4591_v11 = vpop.eup %4590  ;;  %3258 = vst [vmem:[%s6277_s10 + $0x148] sm:$0xff] %v4589_v9  ;;  %4610 = vrcp.f32 %v2928_v49  ;;  %v3631_v49 = vmul.f32 -1.442695, %v5963_v14  ;;  %v3639_v14 = vmul.f32 -1.442695, %v5983_v8 }
 0x51f   :  { %v4593_v60 = vpop.eup %4592  ;;  %3249 = vst [vmem:[%s6277_s10 + $0x100] sm:$0xff] %v4591_v11  ;;  %4612 = vpow2.f32 %v3633_v56  ;;  %v3638_v11 = vmul.f32 -1.442695, %v5977_v12  ;;  %v3646_v12 = vmul.f32 -1.442695, %v5999_v47 }
 0x520   :  { %v4595_v28 = vpop.eup %4594  ;;  %3293 = vst [vmem:[%s6277_s10 + $0x260] sm:$0xff] %v4593_v60  ;;  %4614 = vpow2.f32 %v3596_v34  ;;  %v3652_v8 = vmul.f32 -1.442695, %v6002_v26 }
 0x521   :  { %v4597_v32 = vpop.eup %4596  ;;  %3250 = vst [vmem:[%s6277_s10 + $0x108] sm:$0xff] %v4595_v28  ;;  %4616 = vpow2.f32 %v3654_v15  ;;  %v3632_v15 = vmul.f32 -1.442695, %v5970_v37  ;;  %v3645_v37 = vmul.f32 -1.442695, %v5993_v30 }
 0x522   :  { %v4599_v55 = vpop.eup %4598  ;;  %3279 = vst [vmem:[%s6277_s10 + $0x1f0] sm:$0xff] %v4597_v32  ;;  %4618 = vpow2.f32 %v3597_v57  ;;  %v3653_v30 = vmul.f32 -1.442695, %v6005_v53 }
 0x523   :  { %v4601_v25 = vpop.eup %4600  ;;  %3256 = vst [vmem:[%s6277_s10 + $0x138] sm:$0xff] %v4599_v55  ;;  %4620 = vpow2.f32 %v3640_v24 }
 0x524   :  { %v4603_v31 = vpop.eup %4602  ;;  %3300 = vst [vmem:[%s6277_s10 + $0x298] sm:$0xff] %v4601_v25  ;;  %4622 = vpow2.f32 %v3603_v40 }
 0x525   :  { %v4605_v54 = vpop.eup %4604  ;;  %3257 = vst [vmem:[%s6277_s10 + $0x140] sm:$0xff] %v4603_v31  ;;  %4624 = vpow2.f32 %v3604_v3 }
 0x526   :  { %v4607_v42 = vpop.eup %4606  ;;  %3286 = vst [vmem:[%s6277_s10 + $0x228] sm:$0xff] %v4605_v54  ;;  %4626 = vpow2.f32 %v3610_v17 }
 0x527   :  { %v4609_v23 = vpop.eup %4608  ;;  %3263 = vst [vmem:[%s6277_s10 + $0x170] sm:$0xff] %v4607_v42  ;;  %4628 = vpow2.f32 %v3611_v48 }
 0x528   :  { %v4611_v36 = vpop.eup %4610  ;;  %3321 = vst [vmem:[%s6277_s10 + $0x340] sm:$0xff] %v4609_v23  ;;  %4630 = vpow2.f32 %v3617_v51 }
 0x529   :  { %v4613_v39 = vpop.eup %4612  ;;  %3264 = vst [vmem:[%s6277_s10 + $0x178] sm:$0xff] %v4611_v36  ;;  %4632 = vpow2.f32 %v3618_v20 }
 0x52a   :  { %v4615_v59 = vpop.eup %4614  ;;  %v2971_v43 = vadd.f32 1.0, %v4613_v39  ;;  %4634 = vpow2.f32 %v3624_v58 }
 0x52b   :  { %v4617_v27 = vpop.eup %4616  ;;  %v2934_v41 = vadd.f32 1.0, %v4615_v59  ;;  %4636 = vpow2.f32 %v3625_v35 }
 0x52c   :  { %v4619_v21 = vpop.eup %4618  ;;  %4638 = vrcp.f32 %v2971_v43  ;;  %v2992_v1 = vadd.f32 1.0, %v4617_v27 }
 0x52d   :  { %v4621_v29 = vpop.eup %4620  ;;  %4640 = vrcp.f32 %v2934_v41  ;;  %v2935_v5 = vadd.f32 1.0, %v4619_v21 }
 0x52e   :  { %v4623_v22 = vpop.eup %4622  ;;  %4642 = vrcp.f32 %v2992_v1  ;;  %v2978_v61 = vadd.f32 1.0, %v4621_v29 }
 0x52f   :  { %v4625_v13 = vpop.eup %4624  ;;  %4644 = vrcp.f32 %v2935_v5  ;;  %v2941_v0 = vadd.f32 1.0, %v4623_v22 }
 0x530   :  { %v4627_v38 = vpop.eup %4626  ;;  %4646 = vrcp.f32 %v2978_v61  ;;  %v2942_v50 = vadd.f32 1.0, %v4625_v13 }
 0x531   :  { %v4629_v4 = vpop.eup %4628  ;;  %4648 = vrcp.f32 %v2941_v0  ;;  %v2948_v18 = vadd.f32 1.0, %v4627_v38 }
 0x532   :  { %v4631_v16 = vpop.eup %4630  ;;  %4650 = vrcp.f32 %v2942_v50  ;;  %v2949_v63 = vadd.f32 1.0, %v4629_v4 }
 0x533   :  { %v4633_v7 = vpop.eup %4632  ;;  %4652 = vrcp.f32 %v2948_v18  ;;  %v2955_v46 = vadd.f32 1.0, %v4631_v16 }
 0x534   :  { %v4635_v10 = vpop.eup %4634  ;;  %4654 = vrcp.f32 %v2949_v63  ;;  %v2956_v56 = vadd.f32 1.0, %v4633_v7 }
 0x535   :  { %v4637_v33 = vpop.eup %4636  ;;  %4656 = vrcp.f32 %v2955_v46  ;;  %v2962_v45 = vadd.f32 1.0, %v4635_v10 }
 0x536   :  { %v4639_v34 = vpop.eup %4638  ;;  %4658 = vrcp.f32 %v2956_v56  ;;  %v2963_v9 = vadd.f32 1.0, %v4637_v33 }
 0x537   :  { %v4641_v44 = vpop.eup %4640  ;;  %3307 = vst [vmem:[%s6277_s10 + $0x2d0] sm:$0xff] %v4639_v34  ;;  %4660 = vrcp.f32 %v2962_v45 }
 0x538   :  { %v4643_v57 = vpop.eup %4642  ;;  %3270 = vst [vmem:[%s6277_s10 + $0x1a8] sm:$0xff] %v4641_v44  ;;  %4662 = vrcp.f32 %v2963_v9 }
 0x539   :  { %v4645_v60 = vpop.eup %4644  ;;  %3328 = vst [vmem:[%s6277_s10 + $0x378] sm:$0xff] %v4643_v57  ;;  %4664 = vpow2.f32 %v3631_v49 }
 0x53a   :  { %v4647_v24 = vpop.eup %4646  ;;  %3271 = vst [vmem:[%s6277_s10 + $0x1b0] sm:$0xff] %v4645_v60  ;;  %4666 = vpow2.f32 %v3632_v15 }
 0x53b   :  { %v4649_v2 = vpop.eup %4648  ;;  %3314 = vst [vmem:[%s6277_s10 + $0x308] sm:$0xff] %v4647_v24  ;;  %4668 = vpow2.f32 %v3638_v11 }
 0x53c   :  { %v4651_v19 = vpop.eup %4650  ;;  %3277 = vst [vmem:[%s6277_s10 + $0x1e0] sm:$0xff] %v4649_v2  ;;  %4670 = vpow2.f32 %v3639_v14 }
 0x53d   :  { %v4653_v28 = vpop.eup %4652  ;;  %3278 = vst [vmem:[%s6277_s10 + $0x1e8] sm:$0xff] %v4651_v19  ;;  %4672 = vpow2.f32 %v3645_v37 }
 0x53e   :  { %v4655_v47 = vpop.eup %4654  ;;  %3284 = vst [vmem:[%s6277_s10 + $0x218] sm:$0xff] %v4653_v28  ;;  %4674 = vpow2.f32 %v3646_v12 }
 0x53f   :  { %v4657_v26 = vpop.eup %4656  ;;  %3285 = vst [vmem:[%s6277_s10 + $0x220] sm:$0xff] %v4655_v47  ;;  %4676 = vpow2.f32 %v3652_v8 }
 0x540   :  { %v4659_v52 = vpop.eup %4658  ;;  %3291 = vst [vmem:[%s6277_s10 + $0x250] sm:$0xff] %v4657_v26  ;;  %4678 = vpow2.f32 %v3653_v30 }
 0x541   :  { %v4661_v53 = vpop.eup %4660  ;;  %3292 = vst [vmem:[%s6277_s10 + $0x258] sm:$0xff] %v4659_v52 }
 0x542   :  { %v4663_v40 = vpop.eup %4662  ;;  %3298 = vst [vmem:[%s6277_s10 + $0x288] sm:$0xff] %v4661_v53 }
 0x543   :  { %v4665_v32 = vpop.eup %4664  ;;  %3299 = vst [vmem:[%s6277_s10 + $0x290] sm:$0xff] %v4663_v40 }
 0x544   :  { %v4667_v3 = vpop.eup %4666  ;;  %v2969_v6 = vadd.f32 1.0, %v4665_v32 }
 0x545   :  { %v4669_v55 = vpop.eup %4668  ;;  %v2970_v62 = vadd.f32 1.0, %v4667_v3 }
 0x546   :  { %v4671_v17 = vpop.eup %4670  ;;  %4680 = vrcp.f32 %v2969_v6  ;;  %v2976_v25 = vadd.f32 1.0, %v4669_v55 }
 0x547   :  { %v4673_v48 = vpop.eup %4672  ;;  %4682 = vrcp.f32 %v2970_v62  ;;  %v2977_v31 = vadd.f32 1.0, %v4671_v17 }
 0x548   :  { %v4675_v51 = vpop.eup %4674  ;;  %4684 = vrcp.f32 %v2976_v25  ;;  %v2983_v54 = vadd.f32 1.0, %v4673_v48 }
 0x549   :  { %v4677_v20 = vpop.eup %4676  ;;  %4686 = vrcp.f32 %v2977_v31  ;;  %v2984_v42 = vadd.f32 1.0, %v4675_v51 }
 0x54a   :  { %v4679_v58 = vpop.eup %4678  ;;  %4688 = vrcp.f32 %v2983_v54  ;;  %v2990_v23 = vadd.f32 1.0, %v4677_v20 }
 0x54b   :  { %4690 = vrcp.f32 %v2984_v42  ;;  %v2991_v35 = vadd.f32 1.0, %v4679_v58 }
 0x54c   :  { %4692 = vrcp.f32 %v2990_v23 }
 0x54d   :  { %4694 = vrcp.f32 %v2991_v35 }
 0x550   :  { %v4681_v36 = vpop.eup %4680 }
 0x551   :  { %v4683_v39 = vpop.eup %4682  ;;  %3305 = vst [vmem:[%s6277_s10 + $0x2c0] sm:$0xff] %v4681_v36 }
 0x552   :  { %v4685_v59 = vpop.eup %4684  ;;  %3306 = vst [vmem:[%s6277_s10 + $0x2c8] sm:$0xff] %v4683_v39 }
 0x553   :  { %v4687_v43 = vpop.eup %4686  ;;  %3312 = vst [vmem:[%s6277_s10 + $0x2f8] sm:$0xff] %v4685_v59 }
 0x554   :  { %v4689_v27 = vpop.eup %4688  ;;  %3313 = vst [vmem:[%s6277_s10 + $0x300] sm:$0xff] %v4687_v43 }
 0x555   :  { %v4691_v41 = vpop.eup %4690  ;;  %3319 = vst [vmem:[%s6277_s10 + $0x330] sm:$0xff] %v4689_v27 }
 0x556   :  { %v4693_v21 = vpop.eup %4692  ;;  %3320 = vst [vmem:[%s6277_s10 + $0x338] sm:$0xff] %v4691_v41 }
 0x557   :  { %v4695_v1 = vpop.eup %4694  ;;  %3326 = vst [vmem:[%s6277_s10 + $0x368] sm:$0xff] %v4693_v21 }
 0x558   :  { %3327 = vst [vmem:[%s6277_s10 + $0x370] sm:$0xff] %v4695_v1 }
 0x559   :  { %3354 = vsyncpa [#allocation3], 1 }

</bundles_post_ra>
